<compile_context>
chip_gen: v7x
topology: tpu7x:2x2x1
jax: 0.10.0
libtpu: 0.0.40
codegen_flags: <defaults>
</compile_context>

<pallas_src>
import functools

import jax
import jax.numpy as jnp
from jax.experimental import pallas as pl
from jax.experimental.pallas import tpu as pltpu


def _attn_net_kernel(x_ref, w1_ref, b1_ref, w2t_ref, b2t_ref, at_ref):
    # Layer 1: (tile_n, L) @ (L, D) on the MXU in bf16, f32 accumulation.
    xb = x_ref[...].astype(jnp.bfloat16)          # no-op when x already streams as bf16
    h = jnp.dot(xb, w1_ref[...], preferred_element_type=jnp.float32)
    h = jnp.tanh(h + b1_ref[...])                 # bias + tanh in f32 (VPU/EUP)

    # Layer 2, transposed & bf16: contract D of W2^T (C, D) with D of h (tile_n, D)
    # -> (C, tile_n). tanh output is bounded in [-1, 1], so bf16 here is safe.
    a_t = jax.lax.dot_general(
        w2t_ref[...], h.astype(jnp.bfloat16),
        dimension_numbers=(((1,), (1,)), ((), ())),
        preferred_element_type=jnp.float32,
    )
    at_ref[...] = a_t + b2t_ref[...]              # bias add + store in f32


def _auto_tile(n_rows):
    # >= 2 grid steps for realistic bags (v7x megacore), multiple of 128, capped at
    # 1024 rows so a double-buffered f32 x tile + temps stays well inside VMEM on
    # every generation (incl. v5e with the raised limit below).
    half = -(-n_rows // 2)
    return min(1024, 128 * max(1, -(-half // 128)))


@functools.partial(jax.jit, static_argnames=("tile_n",))
def attn_net_forward(x, w1, b1, w2, b2, *, tile_n=None):
    """Pallas forward of Attn_Net. Returns (A, x) exactly like the PyTorch module.

    x : (N, L)   bag of N instances (f32 or bf16; bf16 halves streamed HBM bytes)
    w1: (L, D),  b1: (D,) or (1, D)
    w2: (D, C),  b2: (C,) or (1, C)
    A is returned in f32 regardless of x dtype.
    """
    N, L = x.shape
    D = w1.shape[1]
    C = w2.shape[1]
    if tile_n is None:
        tile_n = _auto_tile(N)
    assert tile_n % 128 == 0, "tile_n must be a multiple of 128"

    n_tiles = pl.cdiv(N, tile_n)

    w1_in = w1.astype(jnp.bfloat16)                    # (L, D), small, one-time cast
    b1_in = b1.reshape(1, D).astype(jnp.float32)
    w2t_in = jnp.transpose(w2).astype(jnp.bfloat16)    # (C, D)
    b2t_in = b2.reshape(C, 1).astype(jnp.float32)      # (C, 1) broadcasts over lanes

    x_bytes = x.dtype.itemsize
    cost = pl.CostEstimate(
        flops=2 * N * L * D + 2 * N * D * C,
        transcendentals=N * D,
        bytes_accessed=(N * L * x_bytes            # x stream
                        + L * D * 2 + D * 4        # W1 (bf16) + b1
                        + C * D * 2 + C * 4        # W2^T (bf16) + b2
                        + N * C * 4),              # A^T output
    )

    a_t = pl.pallas_call(
        _attn_net_kernel,
        out_shape=jax.ShapeDtypeStruct((C, N), jnp.float32),
        grid_spec=pltpu.PrefetchScalarGridSpec(
            num_scalar_prefetch=0,
            grid=(n_tiles,),
            in_specs=[
                pl.BlockSpec((tile_n, L), lambda i: (i, 0)),   # x tile (streamed)
                pl.BlockSpec((L, D), lambda i: (0, 0)),        # W1 (VMEM-resident)
                pl.BlockSpec((1, D), lambda i: (0, 0)),        # b1
                pl.BlockSpec((C, D), lambda i: (0, 0)),        # W2^T
                pl.BlockSpec((C, 1), lambda i: (0, 0)),        # b2 (column)
            ],
            out_specs=pl.BlockSpec((C, tile_n), lambda i: (0, i)),  # lane-dense A^T
        ),
        compiler_params=pltpu.CompilerParams(
            dimension_semantics=("parallel",),
            vmem_limit_bytes=32 * 1024 * 1024,
        ),
        cost_estimate=cost,
    )(x, w1_in, b1_in, w2t_in, b2t_in)

    a = a_t.T                    # (N, C); tiny reshuffle outside the kernel
    return a, x


def init_params(key, L=1024, D=256, n_classes=1, dtype=jnp.float32):
    """Deterministic init mimicking PyTorch nn.Linear default (uniform +/- 1/sqrt(fan_in))."""
    k1, k2, k3, k4 = jax.random.split(key, 4)
    bound1 = 1.0 / jnp.sqrt(L)
    bound2 = 1.0 / jnp.sqrt(D)
    # Stored already transposed relative to torch (torch weight is (out, in)).
    w1 = jax.random.uniform(k1, (L, D), dtype, -bound1, bound1)
    b1 = jax.random.uniform(k2, (1, D), dtype, -bound1, bound1)
    w2 = jax.random.uniform(k3, (D, n_classes), dtype, -bound2, bound2)
    b2 = jax.random.uniform(k4, (1, n_classes), dtype, -bound2, bound2)
    return w1, b1, w2, b2


if __name__ == "__main__":
    key = jax.random.PRNGKey(0)
    kx, kp = jax.random.split(key)

    # Shapes consistent with CLAM defaults: L=1024, D=256, n_classes=1.
    L, D, C = 1024, 256, 1
    w1, b1, w2, b2 = init_params(kp, L=L, D=D, n_classes=C)

    # (N, tile_n) cases: auto tile (2 tiles, partial tail), exact 128 tiles,
    # single exact tile, ragged N with partial tail, tiny bag with overhanging block.
    for N, tile in ((384, None), (384, 128), (384, 384), (300, None), (100, None)):
        kx, sub = jax.random.split(kx)
        x = jax.random.normal(sub, (N, L), dtype=jnp.float32)
        a, x_out = attn_net_forward(x, w1, b1, w2, b2, tile_n=tile)
        jax.block_until_ready((a, x_out))

        a_ref = jnp.tanh(x @ w1 + b1) @ w2 + b2   # pure-JAX f32 reference
        assert a.shape == (N, C), (N, tile, a.shape)
        assert a.dtype == jnp.float32
        assert x_out.shape == (N, L) and jnp.array_equal(x_out, x)
        err = float(jnp.max(jnp.abs(a - a_ref)))
        # bf16 MXU inputs -> ~1e-3 level absolute error vs f32 reference.
        assert err < 1e-2, (N, tile, err)

    # bf16 producer path: x streamed at half the HBM bytes, no wrapper cast pass.
    x32 = jax.random.normal(jax.random.PRNGKey(7), (384, L), dtype=jnp.float32)
    xb = x32.astype(jnp.bfloat16)
    a, x_out = attn_net_forward(xb, w1, b1, w2, b2)
    jax.block_until_ready((a, x_out))
    a_ref = jnp.tanh(xb.astype(jnp.float32) @ w1 + b1) @ w2 + b2
    assert a.dtype == jnp.float32
    assert float(jnp.max(jnp.abs(a - a_ref))) < 1e-2
    assert x_out.dtype == jnp.bfloat16 and jnp.array_equal(x_out, xb)

    print("KERNEL_OK")
</pallas_src>

<mosaic_0001>
module attributes {stable_mosaic.version = 11 : i64} {
  func.func @_attn_net_kernel(%arg0: i32, %arg1: memref<256x1024xf32, #tpu.memory_space<vmem>>, %arg2: memref<1024x256xbf16, #tpu.memory_space<vmem>>, %arg3: memref<1x256xf32, #tpu.memory_space<vmem>>, %arg4: memref<1x256xbf16, #tpu.memory_space<vmem>>, %arg5: memref<1x1xf32, #tpu.memory_space<vmem>>, %arg6: memref<1x256xf32, #tpu.memory_space<vmem>>) attributes {dimension_semantics = [#tpu.dimension_semantics<parallel>], iteration_bounds = array<i64: 2>, scalar_prefetch = 0 : i64, scratch_operands = 0 : i64, tpu.core_type = #tpu.core_type<tc>, window_params = [{transform_indices = @transform_0, window_bounds = array<i64: 256, 1024>}, {pipeline_mode = #tpu.pipeline_mode<synchronous>, transform_indices = @transform_1, window_bounds = array<i64: 1024, 256>}, {pipeline_mode = #tpu.pipeline_mode<synchronous>, transform_indices = @transform_2, window_bounds = array<i64: 1, 256>}, {pipeline_mode = #tpu.pipeline_mode<synchronous>, transform_indices = @transform_3, window_bounds = array<i64: 1, 256>}, {pipeline_mode = #tpu.pipeline_mode<synchronous>, transform_indices = @transform_4, window_bounds = array<i64: 1, 1>}, {transform_indices = @transform_5, window_bounds = array<i64: 1, 256>}]} {
    %c0 = arith.constant 0 : index
    %c0_0 = arith.constant 0 : index
    %0 = vector.load %arg1[%c0, %c0_0] : memref<256x1024xf32, #tpu.memory_space<vmem>>, vector<256x1024xf32>
    %1 = arith.truncf %0 : vector<256x1024xf32> to vector<256x1024xbf16>
    %c0_1 = arith.constant 0 : index
    %c0_2 = arith.constant 0 : index
    %2 = vector.load %arg2[%c0_1, %c0_2] : memref<1024x256xbf16, #tpu.memory_space<vmem>>, vector<1024x256xbf16>
    %cst = arith.constant dense<0.000000e+00> : vector<256x256xf32>
    %3 = tpu.matmul %1, %2, %cst {dimension_numbers = #tpu.dot_dimension_numbers<[1], [0], [0], [1], [0, 0, 1, 1], [], []>} : vector<256x1024xbf16>, vector<1024x256xbf16>, vector<256x256xf32> -> vector<256x256xf32>
    %c0_3 = arith.constant 0 : index
    %c0_4 = arith.constant 0 : index
    %4 = vector.load %arg3[%c0_3, %c0_4] : memref<1x256xf32, #tpu.memory_space<vmem>>, vector<1x256xf32>
    %5 = vector.broadcast %4 : vector<1x256xf32> to vector<256x256xf32>
    %6 = arith.addf %3, %5 : vector<256x256xf32>
    %7 = math.tanh %6 : vector<256x256xf32>
    %c0_5 = arith.constant 0 : index
    %c0_6 = arith.constant 0 : index
    %8 = vector.load %arg4[%c0_5, %c0_6] : memref<1x256xbf16, #tpu.memory_space<vmem>>, vector<1x256xbf16>
    %9 = arith.truncf %7 : vector<256x256xf32> to vector<256x256xbf16>
    %cst_7 = arith.constant dense<0.000000e+00> : vector<1x256xf32>
    %10 = tpu.matmul %8, %9, %cst_7 {dimension_numbers = #tpu.dot_dimension_numbers<[1], [1], [0], [0], [0, 0, 1, 0], [], []>} : vector<1x256xbf16>, vector<256x256xbf16>, vector<1x256xf32> -> vector<1x256xf32>
    %c0_8 = arith.constant 0 : index
    %c0_9 = arith.constant 0 : index
    %11 = vector.load %arg5[%c0_8, %c0_9] : memref<1x1xf32, #tpu.memory_space<vmem>>, vector<1x1xf32>
    %12 = vector.broadcast %11 : vector<1x1xf32> to vector<1x256xf32>
    %13 = arith.addf %10, %12 : vector<1x256xf32>
    %c0_10 = arith.constant 0 : index
    %c0_11 = arith.constant 0 : index
    %14 = vector.load %arg6[%c0_10, %c0_11] : memref<1x256xf32, #tpu.memory_space<vmem>>, vector<1x256xf32>
    tpu.vector_store %arg6[%c0_10, %c0_11], %13 {strides = array<i32>} : memref<1x256xf32, #tpu.memory_space<vmem>>, vector<1x256xf32>,
    return
  }
  func.func @transform_0(%arg0: i32) -> (i32, i32) {
    %c0_i32 = arith.constant 0 : i32
    %c0_i32_0 = arith.constant 0 : i32
    return %arg0, %c0_i32 : i32, i32
  }
  func.func @transform_1(%arg0: i32) -> (i32, i32) {
    %c0_i32 = arith.constant 0 : i32
    %c0_i32_0 = arith.constant 0 : i32
    %c0_i32_1 = arith.constant 0 : i32
    return %c0_i32, %c0_i32_0 : i32, i32
  }
  func.func @transform_2(%arg0: i32) -> (i32, i32) {
    %c0_i32 = arith.constant 0 : i32
    %c0_i32_0 = arith.constant 0 : i32
    %c0_i32_1 = arith.constant 0 : i32
    return %c0_i32, %c0_i32_0 : i32, i32
  }
  func.func @transform_3(%arg0: i32) -> (i32, i32) {
    %c0_i32 = arith.constant 0 : i32
    %c0_i32_0 = arith.constant 0 : i32
    %c0_i32_1 = arith.constant 0 : i32
    return %c0_i32, %c0_i32_0 : i32, i32
  }
  func.func @transform_4(%arg0: i32) -> (i32, i32) {
    %c0_i32 = arith.constant 0 : i32
    %c0_i32_0 = arith.constant 0 : i32
    %c0_i32_1 = arith.constant 0 : i32
    return %c0_i32, %c0_i32_0 : i32, i32
  }
  func.func @transform_5(%arg0: i32) -> (i32, i32) {
    %c0_i32 = arith.constant 0 : i32
    %c0_i32_0 = arith.constant 0 : i32
    return %c0_i32, %arg0 : i32, i32
  }
}

</mosaic_0001>

<bundles_post_ra>
// kernel: attn_net_forward.1
= control target key start
LH: loop header
LB: loop body
LE: loop exit
PB: predicated region body
PF: predicated region fallthrough
CT: control target
= control target key end

     0   :  { %s4183_s0 = inlined_call_operand.vmem [shape: f32[384,1024], index: 0, kind: input, shape index: {}]   ;;  %s4184_s1 = inlined_call_operand.vmem [shape: bf16[1024,256], index: 1, kind: input, shape index: {}]   ;;  %s4185_s2 = inlined_call_operand.vmem [shape: f32[1,256], index: 2, kind: input, shape index: {}]   ;;  %s4186_s3 = inlined_call_operand.vmem [shape: bf16[1,256], index: 3, kind: input, shape index: {}]   ;;  %s4187_s4 = inlined_call_operand.<no memory space> [shape: f32[1,1], index: 4, kind: input, shape index: {}]   ;;  %s4188_s5 = inlined_call_operand.hbm [shape: f32[1,384], index: 5, kind: output, shape index: {}]  }
   0x1   :  { %v10_v0 = vstv %s4187_s4 }
   0x2   :  { %11 = vst [vmem:[#allocation2] sm:$0x1] %v10_v0 }
   0x3   :  { %12 = vsyncpa [#allocation4], 0 }
   0x4   :  { %14 = vsyncpa [#allocation4 + $0x1], 0  ;;  %s3334_s20 = smov 0   ;;  %s3336_s21 = smov 0  }
   0x5   :  { %s3338_s22 = smov 0   ;;  %s3340_s23 = smov 0  }
   0x6 LB: > { %s3355_s4 = sadd.s32 4294967295, %s3296_s23   ;;  %s2471_s24 = sadd.s32 4294967294, %s3296_s23   ;;  %s3296_s23 = sphi %s3340_s23, %s4194_s23   ;;  %s3292_s22 = sphi %s3338_s22, %s4193_s22   ;;  %s3288_s21 = sphi %s3336_s21, %s4192_s21   ;;  %s3284_s20 = sphi %s3334_s20, %s4191_s20  }
   0x7   : > { %s3359_s25 = sadd.s32 1, %s3296_s23   ;;  %s137_s26 = sadd.s32 1, %s3292_s22 }
   0x8   : > { %s134_s27 = ssub.s32 %s3296_s23, %s3359_s25  ;;  %p147_p0 = scmp.ne.s32.totalorder %s3292_s22, %s3288_s21 }
   0x9   : > { %p135_p1 = scmp.eq.s32.totalorder %s134_s27, 0  ;;  %p148_p2 = scmp.eq.s32.totalorder %s3355_s4, 1 }
   0xa   : > { %p153_p3 = scmp.ne.s32.totalorder %s3288_s21, %s3284_s20  ;;  %p154_p4 = scmp.eq.s32.totalorder %s2471_s24, 1 }
   0xb   : > { %s3370_s28 = scalar_select %p135_p1, %s3292_s22, %s137_s26  }
   0xc   : > { %p3372_p5 = por %p148_p2, %p147_p0  ;;  %p3376_p6 = por %p154_p4, %p153_p3 }
   0xd   : > { %p2474_p7 = scmp.ge.s32.totalorder %s3296_s23, 1  ;;  %p204_p8 = scmp.lt.s32.totalorder %s3296_s23, 3 }
   0xf   : > { %p205_p9 = pnand %p2474_p7, %p204_p8 }
  0x10   : > { %v2914_v1 = vld [vmem:[%s4184_s1 + $0x4] ss:$8 sps:$4 sm:$0xff] (!%p205_p9)   ;;  %v2918_v3 = vld [vmem:[%s4184_s1] ss:$8 sps:$4 sm:$0xff] (!%p205_p9)   ;;  %v2920_v5 = vld [vmem:[%s4184_s1 + $0x14] ss:$8 sps:$4 sm:$0xff] (!%p205_p9)  }
  0x11   : > { %208 = sbr.rel (%p205_p9) target bundleno = 820 (0x334), region = 40  ;;  %v2916_v2 = vld [vmem:[%s4184_s1 + $0x204] ss:$8 sps:$4 sm:$0xff] (!%p205_p9)   ;;  %1424 = vmatprep.subr.bf16.mxu1 (!%p205_p9), %v2914_v1  ;;  %v2919_v4 = vld [vmem:[%s4184_s1 + $0x200] ss:$8 sps:$4 sm:$0xff] (!%p205_p9)   ;;  %s3473_s15 = sshll.u32 (!%p205_p9), %s3355_s4, 5 }
  0x12   : > { %1810 = vmatprep.subr.bf16.mxu0 (!%p205_p9), %v2916_v2  ;;  %1425 = vmatpush1.bf16.msra.mxu1 (!%p205_p9), %v2918_v3  ;;  %v2922_v6 = vld [vmem:[%s4184_s1 + $0x214] ss:$8 sps:$4 sm:$0xff] (!%p205_p9)   ;;  %v2924_v7 = vld [vmem:[%s4184_s1 + $0x10] ss:$8 sps:$4 sm:$0xff] (!%p205_p9)   ;;  %v2926_v9 = vld [vmem:[%s4184_s1 + $0x24] ss:$8 sps:$4 sm:$0xff] (!%p205_p9)  }
  0x13   : > { %1811 = vmatpush1.bf16.msra.mxu0 (!%p205_p9), %v2919_v4  ;;  %1426 = vmatprep.subr.bf16.mxu1 (!%p205_p9), %v2920_v5  ;;  %v2925_v8 = vld [vmem:[%s4184_s1 + $0x210] ss:$8 sps:$4 sm:$0xff] (!%p205_p9)   ;;  %v2928_v10 = vld [vmem:[%s4184_s1 + $0x224] ss:$8 sps:$4 sm:$0xff] (!%p205_p9)   ;;  %v2930_v11 = vld [vmem:[%s4184_s1 + $0x20] ss:$8 sps:$4 sm:$0xff] (!%p205_p9)  }
  0x14   : > { %1812 = vmatprep.subr.bf16.mxu0 (!%p205_p9), %v2922_v6  ;;  %v2931_v12 = vld [vmem:[%s4184_s1 + $0x220] ss:$8 sps:$4 sm:$0xff] (!%p205_p9)   ;;  %v2932_v13 = vld [vmem:[%s4184_s1 + $0x34] ss:$8 sps:$4 sm:$0xff] (!%p205_p9)   ;;  %v2936_v15 = vld [vmem:[%s4184_s1 + $0x30] ss:$8 sps:$4 sm:$0xff] (!%p205_p9)  }
  0x15   : > { %v2934_v14 = vld [vmem:[%s4184_s1 + $0x234] ss:$8 sps:$4 sm:$0xff] (!%p205_p9)   ;;  %v2937_v16 = vld [vmem:[%s4184_s1 + $0x230] ss:$8 sps:$4 sm:$0xff] (!%p205_p9)   ;;  %v2938_v17 = vld [vmem:[%s4184_s1 + $0x44] ss:$8 sps:$4 sm:$0xff] (!%p205_p9)  }
  0x16   : > { %1427 = vmatpush1.bf16.msra.mxu1 (!%p205_p9), %v2924_v7  ;;  %v2940_v18 = vld [vmem:[%s4184_s1 + $0x244] ss:$8 sps:$4 sm:$0xff] (!%p205_p9)   ;;  %v2942_v19 = vld [vmem:[%s4184_s1 + $0x40] ss:$8 sps:$4 sm:$0xff] (!%p205_p9)   ;;  %v2944_v21 = vld [vmem:[%s4184_s1 + $0x54] ss:$8 sps:$4 sm:$0xff] (!%p205_p9)  }
  0x17   : > { %1813 = vmatpush1.bf16.msra.mxu0 (!%p205_p9), %v2925_v8  ;;  %1428 = vmatprep.subr.bf16.mxu1 (!%p205_p9), %v2926_v9  ;;  %v2943_v20 = vld [vmem:[%s4184_s1 + $0x240] ss:$8 sps:$4 sm:$0xff] (!%p205_p9)   ;;  %v2946_v22 = vld [vmem:[%s4184_s1 + $0x254] ss:$8 sps:$4 sm:$0xff] (!%p205_p9)   ;;  %v2948_v23 = vld [vmem:[%s4184_s1 + $0x50] ss:$8 sps:$4 sm:$0xff] (!%p205_p9)  }
  0x18   : > { %1814 = vmatprep.subr.bf16.mxu0 %v2928_v10  ;;  %v2949_v24 = vld [vmem:[%s4184_s1 + $0x250] ss:$8 sps:$4 sm:$0xff]   ;;  %v2950_v25 = vld [vmem:[%s4184_s1 + $0x64] ss:$8 sps:$4 sm:$0xff]   ;;  %v2954_v27 = vld [vmem:[%s4184_s1 + $0x60] ss:$8 sps:$4 sm:$0xff]  }
  0x19   : > { %v2952_v26 = vld [vmem:[%s4184_s1 + $0x264] ss:$8 sps:$4 sm:$0xff]   ;;  %v2955_v28 = vld [vmem:[%s4184_s1 + $0x260] ss:$8 sps:$4 sm:$0xff]   ;;  %v2956_v29 = vld [vmem:[%s4184_s1 + $0x74] ss:$8 sps:$4 sm:$0xff]  }
  0x1a   : > { %1429 = vmatpush1.bf16.msra.mxu1 %v2930_v11  ;;  %v2958_v30 = vld [vmem:[%s4184_s1 + $0x274] ss:$8 sps:$4 sm:$0xff]   ;;  %v2960_v31 = vld [vmem:[%s4184_s1 + $0x70] ss:$8 sps:$4 sm:$0xff]   ;;  %v2962_v33 = vld [vmem:[%s4184_s1 + $0x84] ss:$8 sps:$4 sm:$0xff]  }
  0x1b   : > { %1815 = vmatpush1.bf16.msra.mxu0 %v2931_v12  ;;  %1430 = vmatprep.subr.bf16.mxu1 %v2932_v13  ;;  %v2961_v32 = vld [vmem:[%s4184_s1 + $0x270] ss:$8 sps:$4 sm:$0xff]   ;;  %p244_p10 = scmp.lt.s32.totalorder %s3473_s15, 47  ;;  %v2964_v34 = vld [vmem:[%s4184_s1 + $0x284] ss:$8 sps:$4 sm:$0xff]   ;;  %s2609_s10 = sshll.u32 (%p3372_p5), %s3355_s4, 1 }
  0x1c   : > { %1816 = vmatprep.subr.bf16.mxu0 %v2934_v14  ;;  %v2966_v35 = vld [vmem:[%s4184_s1 + $0x80] ss:$8 sps:$4 sm:$0xff]   ;;  %v2968_v37 = vld [vmem:[%s4184_s1 + $0x94] ss:$8 sps:$4 sm:$0xff]   ;;  %v2972_v39 = vld [vmem:[%s4184_s1 + $0x90] ss:$8 sps:$4 sm:$0xff]  }
  0x1d   : > { %v2967_v36 = vld [vmem:[%s4184_s1 + $0x280] ss:$8 sps:$4 sm:$0xff]   ;;  %s245_s13 = scalar_select %p244_p10, %s3473_s15, 47  ;;  %v2970_v38 = vld [vmem:[%s4184_s1 + $0x294] ss:$8 sps:$4 sm:$0xff]  }
  0x1e   : > { %1431 = vmatpush1.bf16.msra.mxu1 %v2936_v15  ;;  %v2973_v40 = vld [vmem:[%s4184_s1 + $0x290] ss:$8 sps:$4 sm:$0xff]   ;;  %v2974_v41 = vld [vmem:[%s4184_s1 + $0xa4] ss:$8 sps:$4 sm:$0xff]   ;;  %v2978_v43 = vld [vmem:[%s4184_s1 + $0xa0] ss:$8 sps:$4 sm:$0xff]  }
  0x1f   : > { %1817 = vmatpush1.bf16.msra.mxu0 %v2937_v16  ;;  %1432 = vmatprep.subr.bf16.mxu1 %v2938_v17  ;;  %s2615_s6 = sshll.u32 %s245_s13, 6  ;;  %v2976_v42 = vld [vmem:[%s4184_s1 + $0x2a4] ss:$8 sps:$4 sm:$0xff]   ;;  %v2979_v44 = vld [vmem:[%s4184_s1 + $0x2a0] ss:$8 sps:$4 sm:$0xff]   ;;  %s2401_s11 = ssub.s32 (%p3372_p5), 3, %s2609_s10 }
  0x20   : > { %1818 = vmatprep.subr.bf16.mxu0 %v2940_v18  ;;  %s3522_s17 = scalar_lea.vmem %s4183_s0, %s2615_s6  ;;  %v2980_v45 = vld [vmem:[%s4184_s1 + $0xb4] ss:$8 sps:$4 sm:$0xff]   ;;  %v2984_v51 = vld [vmem:[%s4184_s1 + $0xb0] ss:$8 sps:$4 sm:$0xff]   ;;  %v2986_v55 = vld [vmem:[%s4184_s1 + $0xc4] ss:$8 sps:$4 sm:$0xff]  }
  0x21   : > { %v2982_v46 = vld [vmem:[%s4184_s1 + $0x2b4] ss:$8 sps:$4 sm:$0xff]   ;;  %v261_v47 = vld [vmem:[%s3522_s17 + $0x8] sm:$0xff]  ;;  %v2985_v52 = vld [vmem:[%s4184_s1 + $0x2b0] ss:$8 sps:$4 sm:$0xff]   ;;  %s235_s6 = sand.u32 1, %s3288_s21  }
  0x22   : > { %1433 = vmatpush1.bf16.msra.mxu1 %v2942_v19  ;;  %v269_v48 = vld [vmem:[%s3522_s17 + $0x48] sm:$0xff]  ;;  %v2992_v59 = vld [vmem:[%s4184_s1 + $0xd4] ss:$8 sps:$4 sm:$0xff]   ;;  %v2996_v61 = vld [vmem:[%s4184_s1 + $0xd0] ss:$8 sps:$4 sm:$0xff]   ;;  %s2475_s7 = sshll.u32 %s235_s6, 1 }
  0x23   : > { %1819 = vmatpush1.bf16.msra.mxu0 %v2943_v20  ;;  %1434 = vmatprep.subr.bf16.mxu1 %v2944_v21  ;;  %v265_v49 = vld [vmem:[%s3522_s17 + $0x28] sm:$0xff]  ;;  %v517_v53 = vpack.c.bf16 %v269_v48, %v261_v47  ;;  %v2994_v60 = vld [vmem:[%s4184_s1 + $0x2d4] ss:$8 sps:$4 sm:$0xff]   ;;  %v2997_v62 = vld [vmem:[%s4184_s1 + $0x2d0] ss:$8 sps:$4 sm:$0xff]   ;;  %s237_s8 = scalar_lea.vmem [#allocation3], %s2475_s7 }
  0x24   : > { %1820 = vmatprep.subr.bf16.mxu0 %v2946_v22  ;;  %v273_v50 = vld [vmem:[%s3522_s17 + $0x68] sm:$0xff]  ;;  %v3004_v3 = vld [vmem:[%s4184_s1 + $0xf4] ss:$8 sps:$4 sm:$0xff]   ;;  %v3008_v5 = vld [vmem:[%s4184_s1 + $0xf0] ss:$8 sps:$4 sm:$0xff]   ;;  %s4129_s9 = scalar_lea.sflag [#allocation4], %s235_s6 }
  0x25   : > { %v521_v54 = vpack.c.bf16 %v273_v50, %v265_v49  ;;  %v2988_v56 = vld [vmem:[%s4184_s1 + $0x2c4] ss:$8 sps:$4 sm:$0xff]   ;;  %1456 = vmatprep.mubr.bf16.mxu1 %v517_v53  ;;  %v2990_v57 = vld [vmem:[%s4184_s1 + $0xc0] ss:$8 sps:$4 sm:$0xff]   ;;  %v3006_v4 = vld [vmem:[%s4184_s1 + $0x2f4] ss:$8 sps:$4 sm:$0xff]  }
  0x26   : > { %1435 = vmatpush1.bf16.msra.mxu1 %v2948_v23  ;;  %v2991_v58 = vld [vmem:[%s4184_s1 + $0x2c0] ss:$8 sps:$4 sm:$0xff]   ;;  %v2998_v63 = vld [vmem:[%s4184_s1 + $0xe4] ss:$8 sps:$4 sm:$0xff]   ;;  %v3009_v6 = vld [vmem:[%s4184_s1 + $0x2f0] ss:$8 sps:$4 sm:$0xff]  }
  0x27   : > { %1821 = vmatpush1.bf16.msra.mxu0 %v2949_v24  ;;  %1436 = vmatprep.subr.bf16.mxu1 %v2950_v25  ;;  %v3000_v0 = vld [vmem:[%s4184_s1 + $0x2e4] ss:$8 sps:$4 sm:$0xff]   ;;  %v3002_v1 = vld [vmem:[%s4184_s1 + $0xe0] ss:$8 sps:$4 sm:$0xff]   ;;  %v3018_v23 = vld [vmem:[%s4184_s1 + $0x114] ss:$8 sps:$4 sm:$0xff]  }
  0x28   : > { %1822 = vmatprep.subr.bf16.mxu0 %v2952_v26  ;;  %1842 = vmatprep.mubr.bf16.mxu0 %v521_v54  ;;  %v3003_v2 = vld [vmem:[%s4184_s1 + $0x2e0] ss:$8 sps:$4 sm:$0xff]   ;;  %v3012_v9 = vld [vmem:[%s4184_s1 + $0x104] ss:$8 sps:$4 sm:$0xff]   ;;  %v3016_v26 = vld [vmem:[%s4184_s1 + $0x110] ss:$8 sps:$4 sm:$0xff]  }
  0x29   : > { %v260_v7 = vld [vmem:[%s3522_s17] sm:$0xff]  ;;  %v277_v13 = vld [vmem:[%s3522_s17 + $0x88] sm:$0xff]  ;;  %v3033_v47 = vld [vmem:[%s4184_s1 + $0x334] ss:$8 sps:$4 sm:$0xff]   ;;  %p2402_p11 = scmp.lt.s32.totalorder (%p3372_p5), %s2401_s11, 2 }
  0x2a   : > { %1437 = vmatpush1.bf16.msra.mxu1 %v2954_v27  ;;  %v268_v8 = vld [vmem:[%s3522_s17 + $0x40] sm:$0xff]  ;;  %v285_v14 = vld [vmem:[%s3522_s17 + $0xc8] sm:$0xff]  ;;  %v3028_v53 = vld [vmem:[%s4184_s1 + $0x130] ss:$8 sps:$4 sm:$0xff]  }
  0x2b   : > { %1823 = vmatpush1.bf16.msra.mxu0 %v2955_v28  ;;  %1438 = vmatprep.subr.bf16.mxu1 %v2956_v29  ;;  %v264_v10 = vld [vmem:[%s3522_s17 + $0x20] sm:$0xff]  ;;  %v281_v15 = vld [vmem:[%s3522_s17 + $0xa8] sm:$0xff]  ;;  %v516_v17 = vpack.c.bf16 %v268_v8, %v260_v7  ;;  %v525_v21 = vpack.c.bf16 %v285_v14, %v277_v13  ;;  %v3021_v29 = vld [vmem:[%s4184_s1 + $0x314] ss:$8 sps:$4 sm:$0xff]  }
  0x2c   : > { %1824 = vmatprep.subr.bf16.mxu0 %v2958_v30  ;;  %v272_v11 = vld [vmem:[%s3522_s17 + $0x60] sm:$0xff]  ;;  %v289_v16 = vld [vmem:[%s3522_s17 + $0xe8] sm:$0xff]  ;;  %v3019_v30 = vld [vmem:[%s4184_s1 + $0x310] ss:$8 sps:$4 sm:$0xff]  }
  0x2d   : > { %v3015_v12 = vld [vmem:[%s4184_s1 + $0x304] ss:$8 sps:$4 sm:$0xff]   ;;  %v520_v18 = vpack.c.bf16 %v272_v11, %v264_v10  ;;  %v3010_v19 = vld [vmem:[%s4184_s1 + $0x100] ss:$8 sps:$4 sm:$0xff]   ;;  %v529_v22 = vpack.c.bf16 %v289_v16, %v281_v15  ;;  %v3031_v54 = vld [vmem:[%s4184_s1 + $0x330] ss:$8 sps:$4 sm:$0xff]  }
  0x2e   : > { %1439 = vmatpush1.bf16.msra.mxu1 %v2960_v31  ;;  %v3013_v20 = vld [vmem:[%s4184_s1 + $0x300] ss:$8 sps:$4 sm:$0xff]   ;;  %v3043_v10 = vld [vmem:[%s4184_s1 + $0x350] ss:$8 sps:$4 sm:$0xff]   ;;  %v3048_v11 = vld [vmem:[%s4184_s1 + $0x164] ss:$8 sps:$4 sm:$0xff]  }
  0x2f   : > { %1825 = vmatpush1.bf16.msra.mxu0 %v2961_v32  ;;  %1440 = vmatprep.subr.bf16.mxu1 %v2962_v33  ;;  %v276_v24 = vld [vmem:[%s3522_s17 + $0x80] sm:$0xff]  ;;  %v293_v31 = vld [vmem:[%s3522_s17 + $0x108] sm:$0xff] }
  0x30   : > { %1826 = vmatprep.subr.bf16.mxu0 %v2964_v34  ;;  %v284_v25 = vld [vmem:[%s3522_s17 + $0xc0] sm:$0xff]  ;;  %v301_v32 = vld [vmem:[%s3522_s17 + $0x148] sm:$0xff] }
  0x31   : > { %v280_v27 = vld [vmem:[%s3522_s17 + $0xa0] sm:$0xff]  ;;  %v297_v33 = vld [vmem:[%s3522_s17 + $0x128] sm:$0xff] }
  0x32   : > { %1441 = vmatpush1.bf16.msra.mxu1 %v2966_v35  ;;  %v288_v28 = vld [vmem:[%s3522_s17 + $0xe0] sm:$0xff]  ;;  %v305_v34 = vld [vmem:[%s3522_s17 + $0x168] sm:$0xff] }
  0x33   : > { %1827 = vmatpush1.bf16.msra.mxu0 %v2967_v36  ;;  %1442 = vmatprep.subr.bf16.mxu1 %v2968_v37  ;;  %v3024_v35 = vld [vmem:[%s4184_s1 + $0x124] ss:$8 sps:$4 sm:$0xff]   ;;  %v524_v37 = vpack.c.bf16 %v284_v25, %v276_v24 }
  0x34   : > { %1828 = vmatprep.subr.bf16.mxu0 %v2970_v38  ;;  %v3027_v36 = vld [vmem:[%s4184_s1 + $0x324] ss:$8 sps:$4 sm:$0xff]   ;;  %v528_v38 = vpack.c.bf16 %v288_v28, %v280_v27 }
  0x35   : > { %v304_v48 = vld [vmem:[%s3522_s17 + $0x160] sm:$0xff]  ;;  %v309_v49 = vld [vmem:[%s3522_s17 + $0x188] sm:$0xff] }
  0x36   : > { %1443 = vmatpush1.bf16.msra.mxu1 %v2972_v39  ;;  %v533_v39 = vpack.c.bf16 %v301_v32, %v293_v31  ;;  %v317_v50 = vld [vmem:[%s3522_s17 + $0x1c8] sm:$0xff]  ;;  %v336_v24 = vld [vmem:[%s3522_s17 + $0x260] sm:$0xff] }
  0x37   : > { %1829 = vmatpush1.bf16.msra.mxu0 %v2973_v40  ;;  %1444 = vmatprep.subr.bf16.mxu1 %v2974_v41  ;;  %v537_v40 = vpack.c.bf16 %v305_v34, %v297_v33  ;;  %v3022_v41 = vld [vmem:[%s4184_s1 + $0x120] ss:$8 sps:$4 sm:$0xff]   ;;  %v3060_v31 = vld [vmem:[%s4184_s1 + $0x184] ss:$8 sps:$4 sm:$0xff]  }
  0x38   : > { %1830 = vmatprep.subr.bf16.mxu0 %v2976_v42  ;;  %v3025_v42 = vld [vmem:[%s4184_s1 + $0x320] ss:$8 sps:$4 sm:$0xff]   ;;  %v3063_v32 = vld [vmem:[%s4184_s1 + $0x384] ss:$8 sps:$4 sm:$0xff]  }
  0x39   : > { %v329_v7 = vld [vmem:[%s3522_s17 + $0x228] sm:$0xff] }
  0x3a   : > { %1445 = vmatpush1.bf16.msra.mxu1 %v2978_v43  ;;  %v292_v43 = vld [vmem:[%s3522_s17 + $0x100] sm:$0xff]  ;;  %v337_v8 = vld [vmem:[%s3522_s17 + $0x268] sm:$0xff] }
  0x3b   : > { %1831 = vmatpush1.bf16.msra.mxu0 %v2979_v44  ;;  %1446 = vmatprep.subr.bf16.mxu1 %v2980_v45  ;;  %v300_v44 = vld [vmem:[%s3522_s17 + $0x140] sm:$0xff]  ;;  %v553_v16 = vpack.c.bf16 %v337_v8, %v329_v7  ;;  %v341_v25 = vld [vmem:[%s3522_s17 + $0x288] sm:$0xff] }
  0x3c   : > { %1832 = vmatprep.subr.bf16.mxu0 %v2982_v46  ;;  %v296_v45 = vld [vmem:[%s3522_s17 + $0x120] sm:$0xff]  ;;  %v3030_v46 = vld [vmem:[%s4184_s1 + $0x134] ss:$8 sps:$4 sm:$0xff]   ;;  %v345_v27 = vld [vmem:[%s3522_s17 + $0x2a8] sm:$0xff] }
  0x3d   : > { %v353_v28 = vld [vmem:[%s3522_s17 + $0x2e8] sm:$0xff] }
  0x3e   : > { %1447 = vmatpush1.bf16.msra.mxu1 %v2984_v51  ;;  %v313_v51 = vld [vmem:[%s3522_s17 + $0x1a8] sm:$0xff] }
  0x3f   : > { %1833 = vmatpush1.bf16.msra.mxu0 %v2985_v52  ;;  %1448 = vmatprep.subr.bf16.mxu1 %v2986_v55  ;;  %v321_v52 = vld [vmem:[%s3522_s17 + $0x1e8] sm:$0xff] }
  0x40   : > { %1834 = vmatprep.subr.bf16.mxu0 %v2988_v56  ;;  %v3036_v55 = vld [vmem:[%s4184_s1 + $0x144] ss:$8 sps:$4 sm:$0xff]  }
  0x41   : > { %v3039_v56 = vld [vmem:[%s4184_s1 + $0x344] ss:$8 sps:$4 sm:$0xff]  }
  0x42   : > { %1449 = vmatpush1.bf16.msra.mxu1 %v2990_v57  ;;  %v532_v57 = vpack.c.bf16 %v300_v44, %v292_v43  ;;  %v3069_v43 = vld [vmem:[%s4184_s1 + $0x394] ss:$8 sps:$4 sm:$0xff]   ;;  %v352_v44 = vld [vmem:[%s3522_s17 + $0x2e0] sm:$0xff] }
  0x43   : > { %1835 = vmatpush1.bf16.msra.mxu0 %v2991_v58  ;;  %1450 = vmatprep.subr.bf16.mxu1 %v2992_v59  ;;  %v536_v58 = vpack.c.bf16 %v304_v48, %v296_v45  ;;  %v541_v59 = vpack.c.bf16 %v317_v50, %v309_v49  ;;  %v357_v45 = vld [vmem:[%s3522_s17 + $0x308] sm:$0xff]  ;;  %v3064_v49 = vld [vmem:[%s4184_s1 + $0x190] ss:$8 sps:$4 sm:$0xff]  }
  0x44   : > { %1836 = vmatprep.subr.bf16.mxu0 %v2994_v60  ;;  %v545_v60 = vpack.c.bf16 %v321_v52, %v313_v51  ;;  %v369_v48 = vld [vmem:[%s3522_s17 + $0x368] sm:$0xff]  ;;  %v3067_v50 = vld [vmem:[%s4184_s1 + $0x390] ss:$8 sps:$4 sm:$0xff]  }
  0x45   : > { %v3072_v51 = vld [vmem:[%s4184_s1 + $0x1a4] ss:$8 sps:$4 sm:$0xff]  }
  0x46   : > { %1451 = vmatpush1.bf16.msra.mxu1 %v2996_v61  ;;  %v3034_v61 = vld [vmem:[%s4184_s1 + $0x140] ss:$8 sps:$4 sm:$0xff]   ;;  %v3075_v52 = vld [vmem:[%s4184_s1 + $0x3a4] ss:$8 sps:$4 sm:$0xff]  }
  0x47   : > { %1837 = vmatpush1.bf16.msra.mxu0 %v2997_v62  ;;  %1452 = vmatprep.subr.bf16.mxu1 %v2998_v63  ;;  %v3037_v62 = vld [vmem:[%s4184_s1 + $0x340] ss:$8 sps:$4 sm:$0xff]   ;;  %v3042_v63 = vld [vmem:[%s4184_s1 + $0x154] ss:$8 sps:$4 sm:$0xff]   ;;  %v3084_v7 = vld [vmem:[%s4184_s1 + $0x1c4] ss:$8 sps:$4 sm:$0xff]  }
  0x48   : > { %1838 = vmatprep.subr.bf16.mxu0 %v3000_v0  ;;  %v308_v0 = vld [vmem:[%s3522_s17 + $0x180] sm:$0xff] }
  0x4a   : > { %1453 = vmatpush1.bf16.msra.mxu1 %v3002_v1  ;;  %v316_v1 = vld [vmem:[%s3522_s17 + $0x1c0] sm:$0xff] }
  0x4b   : > { %1839 = vmatpush1.bf16.msra.mxu0 %v3003_v2  ;;  %1454 = vmatprep.subr.bf16.mxu1 %v3004_v3  ;;  %v312_v2 = vld [vmem:[%s3522_s17 + $0x1a0] sm:$0xff]  ;;  %v3045_v3 = vld [vmem:[%s4184_s1 + $0x354] ss:$8 sps:$4 sm:$0xff]   ;;  %v540_v13 = vpack.c.bf16 %v316_v1, %v308_v0  ;;  %v373_v1 = vld [vmem:[%s3522_s17 + $0x388] sm:$0xff] }
  0x4c   : > { %1840 = vmatprep.subr.bf16.mxu0 %v3006_v4  ;;  %v320_v4 = vld [vmem:[%s3522_s17 + $0x1e0] sm:$0xff] }
  0x4d   : > { %v544_v14 = vpack.c.bf16 %v320_v4, %v312_v2  ;;  %v368_v0 = vld [vmem:[%s3522_s17 + $0x360] sm:$0xff]  ;;  %v381_v2 = vld [vmem:[%s3522_s17 + $0x3c8] sm:$0xff] }
  0x4e   : > { %1455 = vmatpush1.bf16.msra.mxu1 %v3008_v5  ;;  %v325_v5 = vld [vmem:[%s3522_s17 + $0x208] sm:$0xff] }
  0x4f   : > { %1841 = vmatpush1.bf16.msra.mxu0 %v3009_v6  ;;  %1617 = vmatprep.subr.bf16.mxu1 %v3012_v9  ;;  %v333_v6 = vld [vmem:[%s3522_s17 + $0x248] sm:$0xff]  ;;  %v3040_v9 = vld [vmem:[%s4184_s1 + $0x150] ss:$8 sps:$4 sm:$0xff]  }
  0x50   : > { %2003 = vmatprep.subr.bf16.mxu0 %v3015_v12  ;;  %v3051_v12 = vld [vmem:[%s4184_s1 + $0x364] ss:$8 sps:$4 sm:$0xff]   ;;  %v549_v15 = vpack.c.bf16 %v333_v6, %v325_v5  ;;  %v3076_v5 = vld [vmem:[%s4184_s1 + $0x1b0] ss:$8 sps:$4 sm:$0xff]  }
  0x51   : > { %1457 = vmatmul.mubr.bf16.vlgmr.msra.gmra.mrb[0].mxu1 %v516_v17  ;;  %v3046_v17 = vld [vmem:[%s4184_s1 + $0x160] ss:$8 sps:$4 sm:$0xff]   ;;  %v3079_v6 = vld [vmem:[%s4184_s1 + $0x3b0] ss:$8 sps:$4 sm:$0xff]  }
  0x52   : > { %1843 = vmatmul.mubr.bf16.vlgmr.msra.gmra.mrb[0].mxu0 %v520_v18  ;;  %1618 = vmatpush1.bf16.msra.mxu1 %v3010_v19  ;;  %v3049_v18 = vld [vmem:[%s4184_s1 + $0x360] ss:$8 sps:$4 sm:$0xff]  }
  0x53   : > { %2004 = vmatpush1.bf16.msra.mxu0 %v3013_v20  ;;  %1466 = vmatprep.mubr.bf16.mxu1 %v525_v21  ;;  %v324_v19 = vld [vmem:[%s3522_s17 + $0x200] sm:$0xff]  ;;  %v385_v4 = vld [vmem:[%s3522_s17 + $0x3e8] sm:$0xff] }
  0x54   : > { %1852 = vmatprep.mubr.bf16.mxu0 %v529_v22  ;;  %1619 = vmatprep.subr.bf16.mxu1 %v3018_v23  ;;  %v332_v20 = vld [vmem:[%s3522_s17 + $0x240] sm:$0xff]  ;;  %v3054_v22 = vld [vmem:[%s4184_s1 + $0x174] ss:$8 sps:$4 sm:$0xff]  }
  0x55   : > { %2005 = vmatprep.subr.bf16.mxu0 %v3021_v29  ;;  %v328_v21 = vld [vmem:[%s3522_s17 + $0x220] sm:$0xff]  ;;  %v3057_v23 = vld [vmem:[%s4184_s1 + $0x374] ss:$8 sps:$4 sm:$0xff]   ;;  %v3052_v29 = vld [vmem:[%s4184_s1 + $0x170] ss:$8 sps:$4 sm:$0xff]   ;;  %v548_v33 = vpack.c.bf16 %v332_v20, %v324_v19 }
  0x56   : > { %1620 = vmatpush1.bf16.msra.mxu1 %v3016_v26  ;;  %v349_v26 = vld [vmem:[%s3522_s17 + $0x2c8] sm:$0xff]  ;;  %v552_v34 = vpack.c.bf16 %v336_v24, %v328_v21  ;;  %v3088_v24 = vld [vmem:[%s4184_s1 + $0x1d0] ss:$8 sps:$4 sm:$0xff]  }
  0x57   : > { %2006 = vmatpush1.bf16.msra.mxu0 %v3019_v30  ;;  %1621 = vmatprep.subr.bf16.mxu1 %v3024_v35  ;;  %v3055_v30 = vld [vmem:[%s4184_s1 + $0x370] ss:$8 sps:$4 sm:$0xff]   ;;  %v557_v35 = vpack.c.bf16 %v349_v26, %v341_v25  ;;  %v389_v19 = vld [vmem:[%s3522_s17 + $0x408] sm:$0xff]  ;;  %v3093_v26 = vld [vmem:[%s4184_s1 + $0x3d4] ss:$8 sps:$4 sm:$0xff]  }
  0x58   : > { %2007 = vmatprep.subr.bf16.mxu0 %v3027_v36  ;;  %v561_v36 = vpack.c.bf16 %v353_v28, %v345_v27  ;;  %v397_v20 = vld [vmem:[%s3522_s17 + $0x448] sm:$0xff]  ;;  %v3091_v25 = vld [vmem:[%s4184_s1 + $0x3d0] ss:$8 sps:$4 sm:$0xff]  }
  0x59   : > { %1467 = vmatmul.mubr.bf16.gmra.mrb[4].mxu1 %v524_v37  ;;  %v3058_v37 = vld [vmem:[%s4184_s1 + $0x180] ss:$8 sps:$4 sm:$0xff]  }
  0x5a   : > { %1853 = vmatmul.mubr.bf16.gmra.mrb[4].mxu0 %v528_v38  ;;  %1476 = vmatprep.mubr.bf16.mxu1 %v533_v39  ;;  %v3061_v38 = vld [vmem:[%s4184_s1 + $0x380] ss:$8 sps:$4 sm:$0xff]   ;;  %v3066_v39 = vld [vmem:[%s4184_s1 + $0x194] ss:$8 sps:$4 sm:$0xff]  }
  0x5b   : > { %1862 = vmatprep.mubr.bf16.mxu0 %v537_v40  ;;  %1622 = vmatpush1.bf16.msra.mxu1 %v3022_v41  ;;  %v340_v40 = vld [vmem:[%s3522_s17 + $0x280] sm:$0xff]  ;;  %v393_v21 = vld [vmem:[%s3522_s17 + $0x428] sm:$0xff] }
  0x5c   : > { %2008 = vmatpush1.bf16.msra.mxu0 %v3025_v42  ;;  %1623 = vmatprep.subr.bf16.mxu1 %v3030_v46  ;;  %v348_v41 = vld [vmem:[%s3522_s17 + $0x2c0] sm:$0xff]  ;;  %v365_v46 = vld [vmem:[%s3522_s17 + $0x348] sm:$0xff] }
  0x5d   : > { %2009 = vmatprep.subr.bf16.mxu0 %v3033_v47  ;;  %v344_v42 = vld [vmem:[%s3522_s17 + $0x2a0] sm:$0xff]  ;;  %v361_v47 = vld [vmem:[%s3522_s17 + $0x328] sm:$0xff] }
  0x5f   : > { %1624 = vmatpush1.bf16.msra.mxu1 %v3028_v53  ;;  %v556_v53 = vpack.c.bf16 %v348_v41, %v340_v40  ;;  %v413_v40 = vld [vmem:[%s3522_s17 + $0x4c8] sm:$0xff] }
  0x60   : > { %2010 = vmatpush1.bf16.msra.mxu0 %v3031_v54  ;;  %1625 = vmatprep.subr.bf16.mxu1 %v3036_v55  ;;  %v560_v54 = vpack.c.bf16 %v352_v44, %v344_v42  ;;  %v565_v55 = vpack.c.bf16 %v365_v46, %v357_v45  ;;  %v409_v41 = vld [vmem:[%s3522_s17 + $0x4a8] sm:$0xff]  ;;  %v3102_v44 = vld [vmem:[%s4184_s1 + $0x1f4] ss:$8 sps:$4 sm:$0xff]  }
  0x61   : > { %2011 = vmatprep.subr.bf16.mxu0 %v3039_v56  ;;  %1477 = vmatmul.mubr.bf16.gmra.mrb[8].mxu1 %v532_v57  ;;  %v569_v56 = vpack.c.bf16 %v369_v48, %v361_v47  ;;  %v3070_v57 = vld [vmem:[%s4184_s1 + $0x1a0] ss:$8 sps:$4 sm:$0xff]   ;;  %v3103_v47 = vld [vmem:[%s4184_s1 + $0x3f0] ss:$8 sps:$4 sm:$0xff]   ;;  %v3105_v48 = vld [vmem:[%s4184_s1 + $0x3f4] ss:$8 sps:$4 sm:$0xff]  }
  0x62   : > { %1863 = vmatmul.mubr.bf16.gmra.mrb[8].mxu0 %v536_v58  ;;  %1486 = vmatprep.mubr.bf16.mxu1 %v541_v59  ;;  %v3073_v58 = vld [vmem:[%s4184_s1 + $0x3a0] ss:$8 sps:$4 sm:$0xff]  }
  0x63   : > { %1872 = vmatprep.mubr.bf16.mxu0 %v545_v60  ;;  %1626 = vmatpush1.bf16.msra.mxu1 %v3034_v61  ;;  %v356_v59 = vld [vmem:[%s3522_s17 + $0x300] sm:$0xff]  ;;  %v417_v42 = vld [vmem:[%s3522_s17 + $0x4e8] sm:$0xff] }
  0x64   : > { %2012 = vmatpush1.bf16.msra.mxu0 %v3037_v62  ;;  %1627 = vmatprep.subr.bf16.mxu1 %v3042_v63  ;;  %v364_v60 = vld [vmem:[%s3522_s17 + $0x340] sm:$0xff]  ;;  %v3078_v62 = vld [vmem:[%s4184_s1 + $0x1b4] ss:$8 sps:$4 sm:$0xff]  }
  0x65   : > { %2013 = vmatprep.subr.bf16.mxu0 %v3045_v3  ;;  %v360_v61 = vld [vmem:[%s3522_s17 + $0x320] sm:$0xff]  ;;  %v3081_v63 = vld [vmem:[%s4184_s1 + $0x3b4] ss:$8 sps:$4 sm:$0xff]   ;;  %v377_v3 = vld [vmem:[%s3522_s17 + $0x3a8] sm:$0xff]  ;;  %v564_v8 = vpack.c.bf16 %v364_v60, %v356_v59 }
  0x67   : > { %1628 = vmatpush1.bf16.msra.mxu1 %v3040_v9  ;;  %v568_v9 = vpack.c.bf16 %v368_v0, %v360_v61  ;;  %v428_v0 = vld [vmem:[%s3522_s17 + $0x540] sm:$0xff] }
  0x68   : > { %2014 = vmatpush1.bf16.msra.mxu0 %v3043_v10  ;;  %1629 = vmatprep.subr.bf16.mxu1 %v3048_v11  ;;  %v3087_v10 = vld [vmem:[%s4184_s1 + $0x3c4] ss:$8 sps:$4 sm:$0xff]   ;;  %v573_v11 = vpack.c.bf16 %v381_v2, %v373_v1 }
  0x69   : > { %2015 = vmatprep.subr.bf16.mxu0 %v3051_v12  ;;  %1487 = vmatmul.mubr.bf16.gmra.mrb[12].mxu1 %v540_v13  ;;  %v577_v12 = vpack.c.bf16 %v385_v4, %v377_v3  ;;  %v3082_v13 = vld [vmem:[%s4184_s1 + $0x1c0] ss:$8 sps:$4 sm:$0xff]  }
  0x6a   : > { %1873 = vmatmul.mubr.bf16.gmra.mrb[12].mxu0 %v544_v14  ;;  %1496 = vmatprep.mubr.bf16.mxu1 %v549_v15  ;;  %v3085_v14 = vld [vmem:[%s4184_s1 + $0x3c0] ss:$8 sps:$4 sm:$0xff]  }
  0x6b   : > { %1882 = vmatprep.mubr.bf16.mxu0 %v553_v16  ;;  %1630 = vmatpush1.bf16.msra.mxu1 %v3046_v17  ;;  %v372_v15 = vld [vmem:[%s3522_s17 + $0x380] sm:$0xff]  ;;  %v437_v3 = vld [vmem:[%s3522_s17 + $0x588] sm:$0xff] }
  0x6c   : > { %2016 = vmatpush1.bf16.msra.mxu0 %v3049_v18  ;;  %1631 = vmatprep.subr.bf16.mxu1 %v3054_v22  ;;  %v380_v16 = vld [vmem:[%s3522_s17 + $0x3c0] sm:$0xff]  ;;  %v3090_v22 = vld [vmem:[%s4184_s1 + $0x1d4] ss:$8 sps:$4 sm:$0xff]   ;;  %v445_v4 = vld [vmem:[%s3522_s17 + $0x5c8] sm:$0xff] }
  0x6d   : > { %2017 = vmatprep.subr.bf16.mxu0 %v3057_v23  ;;  %v376_v17 = vld [vmem:[%s3522_s17 + $0x3a0] sm:$0xff]  ;;  %v401_v23 = vld [vmem:[%s3522_s17 + $0x468] sm:$0xff]  ;;  %v572_v27 = vpack.c.bf16 %v380_v16, %v372_v15 }
  0x6e   : > { %v384_v18 = vld [vmem:[%s3522_s17 + $0x3e0] sm:$0xff]  ;;  %v453_v15 = vld [vmem:[%s3522_s17 + $0x608] sm:$0xff] }
  0x6f   : > { %1632 = vmatpush1.bf16.msra.mxu1 %v3052_v29  ;;  %v576_v28 = vpack.c.bf16 %v384_v18, %v376_v17  ;;  %v581_v29 = vpack.c.bf16 %v397_v20, %v389_v19  ;;  %v424_v1 = vld [vmem:[%s3522_s17 + $0x520] sm:$0xff]  ;;  %v461_v16 = vld [vmem:[%s3522_s17 + $0x648] sm:$0xff] }
  0x70   : > { %2018 = vmatpush1.bf16.msra.mxu0 %v3055_v30  ;;  %1633 = vmatprep.subr.bf16.mxu1 %v3060_v31  ;;  %v585_v30 = vpack.c.bf16 %v401_v23, %v393_v21  ;;  %v3096_v31 = vld [vmem:[%s4184_s1 + $0x1e4] ss:$8 sps:$4 sm:$0xff]   ;;  %v613_v21 = vpack.c.bf16 %v461_v16, %v453_v15 }
  0x71   : > { %2019 = vmatprep.subr.bf16.mxu0 %v3063_v32  ;;  %1497 = vmatmul.mubr.bf16.gmra.mrb[16].mxu1 %v548_v33  ;;  %v3094_v32 = vld [vmem:[%s4184_s1 + $0x1e0] ss:$8 sps:$4 sm:$0xff]  }
  0x72   : > { %1883 = vmatmul.mubr.bf16.gmra.mrb[16].mxu0 %v552_v34  ;;  %1506 = vmatprep.mubr.bf16.mxu1 %v557_v35  ;;  %v388_v33 = vld [vmem:[%s3522_s17 + $0x400] sm:$0xff]  ;;  %v457_v17 = vld [vmem:[%s3522_s17 + $0x628] sm:$0xff] }
  0x73   : > { %1892 = vmatprep.mubr.bf16.mxu0 %v561_v36  ;;  %1634 = vmatpush1.bf16.msra.mxu1 %v3058_v37  ;;  %v396_v34 = vld [vmem:[%s3522_s17 + $0x440] sm:$0xff]  ;;  %v465_v18 = vld [vmem:[%s3522_s17 + $0x668] sm:$0xff] }
  0x74   : > { %2020 = vmatpush1.bf16.msra.mxu0 %v3061_v38  ;;  %1635 = vmatprep.subr.bf16.mxu1 %v3066_v39  ;;  %v392_v35 = vld [vmem:[%s3522_s17 + $0x420] sm:$0xff]  ;;  %v405_v39 = vld [vmem:[%s3522_s17 + $0x488] sm:$0xff]  ;;  %v580_v45 = vpack.c.bf16 %v396_v34, %v388_v33 }
  0x75   : > { %2021 = vmatprep.subr.bf16.mxu0 %v3069_v43  ;;  %v3097_v36 = vld [vmem:[%s4184_s1 + $0x3e0] ss:$8 sps:$4 sm:$0xff]   ;;  %v3099_v37 = vld [vmem:[%s4184_s1 + $0x3e4] ss:$8 sps:$4 sm:$0xff]   ;;  %v3100_v43 = vld [vmem:[%s4184_s1 + $0x1f0] ss:$8 sps:$4 sm:$0xff]  }
  0x76   : > { %v400_v38 = vld [vmem:[%s3522_s17 + $0x460] sm:$0xff] }
  0x77   : > { %1636 = vmatpush1.bf16.msra.mxu1 %v3064_v49  ;;  %v584_v46 = vpack.c.bf16 %v400_v38, %v392_v35  ;;  %v589_v49 = vpack.c.bf16 %v413_v40, %v405_v39  ;;  %v432_v2 = vld [vmem:[%s3522_s17 + $0x560] sm:$0xff]  ;;  %v485_v39 = vld [vmem:[%s3522_s17 + $0x708] sm:$0xff] }
  0x78   : > { %2022 = vmatpush1.bf16.msra.mxu0 %v3067_v50  ;;  %1637 = vmatprep.subr.bf16.mxu1 %v3072_v51  ;;  %v593_v50 = vpack.c.bf16 %v417_v42, %v409_v41  ;;  %v404_v51 = vld [vmem:[%s3522_s17 + $0x480] sm:$0xff]  ;;  %v493_v40 = vld [vmem:[%s3522_s17 + $0x748] sm:$0xff] }
  0x79   : > { %2023 = vmatprep.subr.bf16.mxu0 %v3075_v52  ;;  %1507 = vmatmul.mubr.bf16.gmra.mrb[20].mxu1 %v556_v53  ;;  %v412_v52 = vld [vmem:[%s3522_s17 + $0x4c0] sm:$0xff]  ;;  %v489_v41 = vld [vmem:[%s3522_s17 + $0x728] sm:$0xff] }
  0x7a   : > { %1893 = vmatmul.mubr.bf16.gmra.mrb[20].mxu0 %v560_v54  ;;  %1516 = vmatprep.mubr.bf16.mxu1 %v565_v55  ;;  %v408_v53 = vld [vmem:[%s3522_s17 + $0x4a0] sm:$0xff]  ;;  %v421_v55 = vld [vmem:[%s3522_s17 + $0x508] sm:$0xff]  ;;  %v588_v59 = vpack.c.bf16 %v412_v52, %v404_v51 }
  0x7b   : > { %1902 = vmatprep.mubr.bf16.mxu0 %v569_v56  ;;  %1638 = vmatpush1.bf16.msra.mxu1 %v3070_v57  ;;  %v416_v54 = vld [vmem:[%s3522_s17 + $0x4e0] sm:$0xff]  ;;  %v429_v56 = vld [vmem:[%s3522_s17 + $0x548] sm:$0xff] }
  0x7c   : > { %2024 = vmatpush1.bf16.msra.mxu0 %v3073_v58  ;;  %1639 = vmatprep.subr.bf16.mxu1 %v3078_v62  ;;  %v425_v57 = vld [vmem:[%s3522_s17 + $0x528] sm:$0xff]  ;;  %v592_v60 = vpack.c.bf16 %v416_v54, %v408_v53  ;;  %v597_v61 = vpack.c.bf16 %v429_v56, %v421_v55  ;;  %v452_v23 = vld [vmem:[%s3522_s17 + $0x600] sm:$0xff] }
  0x7d   : > { %2025 = vmatprep.subr.bf16.mxu0 %v3081_v63  ;;  %v433_v58 = vld [vmem:[%s3522_s17 + $0x568] sm:$0xff]  ;;  %v420_v63 = vld [vmem:[%s3522_s17 + $0x500] sm:$0xff] }
  0x7e   : > { %v601_v62 = vpack.c.bf16 %v433_v58, %v425_v57  ;;  %v468_v35 = vld [vmem:[%s3522_s17 + $0x680] sm:$0xff]  ;;  %v497_v42 = vld [vmem:[%s3522_s17 + $0x768] sm:$0xff] }
  0x7f   : > { %1640 = vmatpush1.bf16.msra.mxu1 %v3076_v5  ;;  %v441_v5 = vld [vmem:[%s3522_s17 + $0x5a8] sm:$0xff]  ;;  %v480_v38 = vld [vmem:[%s3522_s17 + $0x6e0] sm:$0xff] }
  0x80   : > { %2026 = vmatpush1.bf16.msra.mxu0 %v3079_v6  ;;  %1641 = vmatprep.subr.bf16.mxu1 %v3084_v7  ;;  %v449_v6 = vld [vmem:[%s3522_s17 + $0x5e8] sm:$0xff]  ;;  %v596_v7 = vpack.c.bf16 %v428_v0, %v420_v63  ;;  %v263_v63 = vld [vmem:[%s3522_s17 + $0x18] sm:$0xff] }
  0x81   : > { %2027 = vmatprep.subr.bf16.mxu0 %v3087_v10  ;;  %1517 = vmatmul.mubr.bf16.gmra.mrb[24].mxu1 %v564_v8  ;;  %v600_v8 = vpack.c.bf16 %v432_v2, %v424_v1  ;;  %v609_v10 = vpack.c.bf16 %v449_v6, %v441_v5  ;;  %v501_v51 = vld [vmem:[%s3522_s17 + $0x788] sm:$0xff]  ;;  %v271_v0 = vld [vmem:[%s3522_s17 + $0x58] sm:$0xff] }
  0x82   : > { %1903 = vmatmul.mubr.bf16.gmra.mrb[24].mxu0 %v568_v9  ;;  %1526 = vmatprep.mubr.bf16.mxu1 %v573_v11  ;;  %v605_v9 = vpack.c.bf16 %v445_v4, %v437_v3  ;;  %v436_v11 = vld [vmem:[%s3522_s17 + $0x580] sm:$0xff]  ;;  %v509_v52 = vld [vmem:[%s3522_s17 + $0x7c8] sm:$0xff]  ;;  %v267_v1 = vld [vmem:[%s3522_s17 + $0x38] sm:$0xff]  ;;  %v519_v5 = vpack.c.bf16 %v271_v0, %v263_v63 }
  0x83   : > { %1912 = vmatprep.mubr.bf16.mxu0 %v577_v12  ;;  %1642 = vmatpush1.bf16.msra.mxu1 %v3082_v13  ;;  %v444_v12 = vld [vmem:[%s3522_s17 + $0x5c0] sm:$0xff]  ;;  %v505_v53 = vld [vmem:[%s3522_s17 + $0x7a8] sm:$0xff]  ;;  %v637_v57 = vpack.c.bf16 %v509_v52, %v501_v51  ;;  %v275_v2 = vld [vmem:[%s3522_s17 + $0x78] sm:$0xff] }
  0x84   : > { %2028 = vmatpush1.bf16.msra.mxu0 %v3085_v14  ;;  %1643 = vmatprep.subr.bf16.mxu1 %v3090_v22  ;;  %v440_v13 = vld [vmem:[%s3522_s17 + $0x5a0] sm:$0xff]  ;;  %v604_v19 = vpack.c.bf16 %v444_v12, %v436_v11  ;;  %v617_v22 = vpack.c.bf16 %v465_v18, %v457_v17  ;;  %v513_v54 = vld [vmem:[%s3522_s17 + $0x7e8] sm:$0xff]  ;;  %v523_v6 = vpack.c.bf16 %v275_v2, %v267_v1  ;;  %v279_v11 = vld [vmem:[%s3522_s17 + $0x98] sm:$0xff] }
  0x85   : > { %2029 = vmatprep.subr.bf16.mxu0 %v3093_v26  ;;  %v448_v14 = vld [vmem:[%s3522_s17 + $0x5e0] sm:$0xff]  ;;  %v641_v58 = vpack.c.bf16 %v513_v54, %v505_v53  ;;  %v287_v12 = vld [vmem:[%s3522_s17 + $0xd8] sm:$0xff] }
  0x86   : > { %v608_v20 = vpack.c.bf16 %v448_v14, %v440_v13  ;;  %v464_v26 = vld [vmem:[%s3522_s17 + $0x660] sm:$0xff]  ;;  %v283_v13 = vld [vmem:[%s3522_s17 + $0xb8] sm:$0xff]  ;;  %v527_v17 = vpack.c.bf16 %v287_v12, %v279_v11 }
  0x87   : > { %1644 = vmatpush1.bf16.msra.mxu1 %v3088_v24  ;;  %v460_v24 = vld [vmem:[%s3522_s17 + $0x640] sm:$0xff]  ;;  %v291_v14 = vld [vmem:[%s3522_s17 + $0xf8] sm:$0xff] }
  0x88   : > { %2030 = vmatpush1.bf16.msra.mxu0 %v3091_v25  ;;  %1645 = vmatprep.subr.bf16.mxu1 %v3096_v31  ;;  %v456_v25 = vld [vmem:[%s3522_s17 + $0x620] sm:$0xff]  ;;  %v612_v31 = vpack.c.bf16 %v460_v24, %v452_v23  ;;  %v531_v18 = vpack.c.bf16 %v291_v14, %v283_v13  ;;  %v295_v23 = vld [vmem:[%s3522_s17 + $0x118] sm:$0xff] }
  0x89   : > { %1527 = vmatmul.mubr.bf16.gmra.mrb[28].mxu1 %v572_v27  ;;  %2031 = vmatprep.subr.bf16.mxu0 %v3099_v37  ;;  %v469_v27 = vld [vmem:[%s3522_s17 + $0x688] sm:$0xff]  ;;  %v472_v37 = vld [vmem:[%s3522_s17 + $0x6a0] sm:$0xff]  ;;  %v303_v24 = vld [vmem:[%s3522_s17 + $0x158] sm:$0xff] }
  0x8a   : > { %1913 = vmatmul.mubr.bf16.gmra.mrb[28].mxu0 %v576_v28  ;;  %1536 = vmatprep.mubr.bf16.mxu1 %v581_v29  ;;  %v477_v28 = vld [vmem:[%s3522_s17 + $0x6c8] sm:$0xff] }
  0x8b   : > { %1922 = vmatprep.mubr.bf16.mxu0 %v585_v30  ;;  %1646 = vmatpush1.bf16.msra.mxu1 %v3094_v32  ;;  %v473_v29 = vld [vmem:[%s3522_s17 + $0x6a8] sm:$0xff]  ;;  %v616_v32 = vpack.c.bf16 %v464_v26, %v456_v25  ;;  %v621_v33 = vpack.c.bf16 %v477_v28, %v469_v27  ;;  %v299_v25 = vld [vmem:[%s3522_s17 + $0x138] sm:$0xff] }
  0x8c   : > { %2032 = vmatpush1.bf16.msra.mxu0 %v3097_v36  ;;  %1647 = vmatprep.subr.bf16.mxu1 %v3102_v44  ;;  %v481_v30 = vld [vmem:[%s3522_s17 + $0x6e8] sm:$0xff]  ;;  %v476_v36 = vld [vmem:[%s3522_s17 + $0x6c0] sm:$0xff]  ;;  %v624_v44 = vpack.c.bf16 %v480_v38, %v472_v37  ;;  %v307_v26 = vld [vmem:[%s3522_s17 + $0x178] sm:$0xff] }
  0x8d   : > { %2033 = vmatprep.subr.bf16.mxu0 %v3105_v48  ;;  %v625_v34 = vpack.c.bf16 %v481_v30, %v473_v29  ;;  %v492_v48 = vld [vmem:[%s3522_s17 + $0x740] sm:$0xff]  ;;  %v535_v29 = vpack.c.bf16 %v303_v24, %v295_v23  ;;  %v539_v30 = vpack.c.bf16 %v307_v26, %v299_v25  ;;  %v315_v37 = vld [vmem:[%s3522_s17 + $0x1b8] sm:$0xff] }
  0x8e   : > { %v323_v38 = vld [vmem:[%s3522_s17 + $0x1f8] sm:$0xff] }
  0x8f   : > { %1648 = vmatpush1.bf16.msra.mxu1 %v3100_v43  ;;  %v620_v43 = vpack.c.bf16 %v476_v36, %v468_v35  ;;  %v311_v35 = vld [vmem:[%s3522_s17 + $0x198] sm:$0xff] }
  0x90   : > { %2034 = vmatpush1.bf16.msra.mxu0 %v3103_v47  ;;  %v484_v47 = vld [vmem:[%s3522_s17 + $0x700] sm:$0xff]  ;;  %v319_v36 = vld [vmem:[%s3522_s17 + $0x1d8] sm:$0xff] }
  0x91   : > { %1537 = vmatmul.mubr.bf16.gmra.mrb[32].mxu1 %v580_v45  ;;  %v629_v45 = vpack.c.bf16 %v493_v40, %v485_v39  ;;  %v628_v55 = vpack.c.bf16 %v492_v48, %v484_v47  ;;  %v327_v47 = vld [vmem:[%s3522_s17 + $0x218] sm:$0xff] }
  0x92   : > { %1923 = vmatmul.mubr.bf16.gmra.mrb[32].mxu0 %v584_v46  ;;  %1546 = vmatprep.mubr.bf16.mxu1 %v589_v49  ;;  %v633_v46 = vpack.c.bf16 %v497_v42, %v489_v41  ;;  %v488_v49 = vld [vmem:[%s3522_s17 + $0x720] sm:$0xff]  ;;  %v543_v41 = vpack.c.bf16 %v319_v36, %v311_v35  ;;  %v547_v42 = vpack.c.bf16 %v323_v38, %v315_v37  ;;  %v335_v48 = vld [vmem:[%s3522_s17 + $0x258] sm:$0xff] }
  0x93   : > { %1932 = vmatprep.mubr.bf16.mxu0 %v593_v50  ;;  %v496_v50 = vld [vmem:[%s3522_s17 + $0x760] sm:$0xff]  ;;  %v551_v53 = vpack.c.bf16 %v335_v48, %v327_v47 }
  0x94   : > { %v632_v56 = vpack.c.bf16 %v496_v50, %v488_v49  ;;  %v331_v49 = vld [vmem:[%s3522_s17 + $0x238] sm:$0xff] }
  0x95   : > { %v339_v50 = vld [vmem:[%s3522_s17 + $0x278] sm:$0xff] }
  0x96   : > { %v555_v54 = vpack.c.bf16 %v339_v50, %v331_v49 }
  0x99   : > { %1547 = vmatmul.mubr.bf16.gmra.mrb[36].mxu1 %v588_v59  ;;  %v500_v59 = vld [vmem:[%s3522_s17 + $0x780] sm:$0xff] }
  0x9a   : > { %1933 = vmatmul.mubr.bf16.gmra.mrb[36].mxu0 %v592_v60  ;;  %1556 = vmatprep.mubr.bf16.mxu1 %v597_v61  ;;  %v508_v60 = vld [vmem:[%s3522_s17 + $0x7c0] sm:$0xff] }
  0x9b   : > { %1942 = vmatprep.mubr.bf16.mxu0 %v601_v62  ;;  %v504_v61 = vld [vmem:[%s3522_s17 + $0x7a0] sm:$0xff]  ;;  %v636_v3 = vpack.c.bf16 %v508_v60, %v500_v59  ;;  %v343_v59 = vld [vmem:[%s3522_s17 + $0x298] sm:$0xff] }
  0x9c   : > { %v512_v62 = vld [vmem:[%s3522_s17 + $0x7e0] sm:$0xff]  ;;  %v351_v60 = vld [vmem:[%s3522_s17 + $0x2d8] sm:$0xff] }
  0x9d   : > { %v640_v4 = vpack.c.bf16 %v512_v62, %v504_v61  ;;  %v347_v61 = vld [vmem:[%s3522_s17 + $0x2b8] sm:$0xff]  ;;  %v559_v1 = vpack.c.bf16 %v351_v60, %v343_v59 }
  0x9e   : > { %v355_v62 = vld [vmem:[%s3522_s17 + $0x2f8] sm:$0xff] }
  0x9f   : > { %v563_v2 = vpack.c.bf16 %v355_v62, %v347_v61 }
  0xa1   : > { %1557 = vmatmul.mubr.bf16.gmra.mrb[40].mxu1 %v596_v7  ;;  %v262_v7 = vld [vmem:[%s3522_s17 + $0x10] sm:$0xff] }
  0xa2   : > { %1943 = vmatmul.mubr.bf16.gmra.mrb[40].mxu0 %v600_v8  ;;  %1566 = vmatprep.mubr.bf16.mxu1 %v605_v9  ;;  %v270_v8 = vld [vmem:[%s3522_s17 + $0x50] sm:$0xff] }
  0xa3   : > { %1952 = vmatprep.mubr.bf16.mxu0 %v609_v10  ;;  %v266_v9 = vld [vmem:[%s3522_s17 + $0x30] sm:$0xff]  ;;  %v518_v15 = vpack.c.bf16 %v270_v8, %v262_v7  ;;  %v359_v7 = vld [vmem:[%s3522_s17 + $0x318] sm:$0xff] }
  0xa4   : > { %v274_v10 = vld [vmem:[%s3522_s17 + $0x70] sm:$0xff]  ;;  %v367_v8 = vld [vmem:[%s3522_s17 + $0x358] sm:$0xff] }
  0xa5   : > { %v522_v16 = vpack.c.bf16 %v274_v10, %v266_v9  ;;  %v363_v9 = vld [vmem:[%s3522_s17 + $0x338] sm:$0xff]  ;;  %v567_v13 = vpack.c.bf16 %v367_v8, %v359_v7 }
  0xa6   : > { %v371_v10 = vld [vmem:[%s3522_s17 + $0x378] sm:$0xff] }
  0xa7   : > { %v571_v14 = vpack.c.bf16 %v371_v10, %v363_v9 }
  0xa9   : > { %1567 = vmatmul.mubr.bf16.gmra.mrb[44].mxu1 %v604_v19  ;;  %v278_v19 = vld [vmem:[%s3522_s17 + $0x90] sm:$0xff] }
  0xaa   : > { %1953 = vmatmul.mubr.bf16.gmra.mrb[44].mxu0 %v608_v20  ;;  %1576 = vmatprep.mubr.bf16.mxu1 %v613_v21  ;;  %v286_v20 = vld [vmem:[%s3522_s17 + $0xd0] sm:$0xff] }
  0xab   : > { %1962 = vmatprep.mubr.bf16.mxu0 %v617_v22  ;;  %v282_v21 = vld [vmem:[%s3522_s17 + $0xb0] sm:$0xff]  ;;  %v526_v27 = vpack.c.bf16 %v286_v20, %v278_v19  ;;  %v375_v19 = vld [vmem:[%s3522_s17 + $0x398] sm:$0xff] }
  0xac   : > { %v290_v22 = vld [vmem:[%s3522_s17 + $0xf0] sm:$0xff]  ;;  %v383_v20 = vld [vmem:[%s3522_s17 + $0x3d8] sm:$0xff] }
  0xad   : > { %v530_v28 = vpack.c.bf16 %v290_v22, %v282_v21  ;;  %v379_v21 = vld [vmem:[%s3522_s17 + $0x3b8] sm:$0xff]  ;;  %v575_v25 = vpack.c.bf16 %v383_v20, %v375_v19 }
  0xae   : > { %v387_v22 = vld [vmem:[%s3522_s17 + $0x3f8] sm:$0xff] }
  0xaf   : > { %v579_v26 = vpack.c.bf16 %v387_v22, %v379_v21 }
  0xb1   : > { %1577 = vmatmul.mubr.bf16.gmra.mrb[48].mxu1 %v612_v31  ;;  %v294_v31 = vld [vmem:[%s3522_s17 + $0x110] sm:$0xff] }
  0xb2   : > { %1963 = vmatmul.mubr.bf16.gmra.mrb[48].mxu0 %v616_v32  ;;  %1586 = vmatprep.mubr.bf16.mxu1 %v621_v33  ;;  %v302_v32 = vld [vmem:[%s3522_s17 + $0x150] sm:$0xff] }
  0xb3   : > { %1972 = vmatprep.mubr.bf16.mxu0 %v625_v34  ;;  %v298_v33 = vld [vmem:[%s3522_s17 + $0x130] sm:$0xff]  ;;  %v534_v39 = vpack.c.bf16 %v302_v32, %v294_v31  ;;  %v391_v31 = vld [vmem:[%s3522_s17 + $0x418] sm:$0xff] }
  0xb4   : > { %v306_v34 = vld [vmem:[%s3522_s17 + $0x170] sm:$0xff]  ;;  %v399_v32 = vld [vmem:[%s3522_s17 + $0x458] sm:$0xff] }
  0xb5   : > { %v538_v40 = vpack.c.bf16 %v306_v34, %v298_v33  ;;  %v395_v33 = vld [vmem:[%s3522_s17 + $0x438] sm:$0xff]  ;;  %v583_v37 = vpack.c.bf16 %v399_v32, %v391_v31 }
  0xb6   : > { %v403_v34 = vld [vmem:[%s3522_s17 + $0x478] sm:$0xff] }
  0xb7   : > { %v587_v38 = vpack.c.bf16 %v403_v34, %v395_v33 }
  0xb9   : > { %1587 = vmatmul.mubr.bf16.gmra.mrb[52].mxu1 %v620_v43  ;;  %v310_v43 = vld [vmem:[%s3522_s17 + $0x190] sm:$0xff] }
  0xba   : > { %1973 = vmatmul.mubr.bf16.gmra.mrb[52].mxu0 %v624_v44  ;;  %1596 = vmatprep.mubr.bf16.mxu1 %v629_v45  ;;  %v318_v44 = vld [vmem:[%s3522_s17 + $0x1d0] sm:$0xff] }
  0xbb   : > { %1982 = vmatprep.mubr.bf16.mxu0 %v633_v46  ;;  %v314_v45 = vld [vmem:[%s3522_s17 + $0x1b0] sm:$0xff]  ;;  %v542_v51 = vpack.c.bf16 %v318_v44, %v310_v43  ;;  %v407_v43 = vld [vmem:[%s3522_s17 + $0x498] sm:$0xff] }
  0xbc   : > { %v322_v46 = vld [vmem:[%s3522_s17 + $0x1f0] sm:$0xff]  ;;  %v415_v44 = vld [vmem:[%s3522_s17 + $0x4d8] sm:$0xff] }
  0xbd   : > { %v546_v52 = vpack.c.bf16 %v322_v46, %v314_v45  ;;  %v411_v45 = vld [vmem:[%s3522_s17 + $0x4b8] sm:$0xff]  ;;  %v591_v49 = vpack.c.bf16 %v415_v44, %v407_v43 }
  0xbe   : > { %v419_v46 = vld [vmem:[%s3522_s17 + $0x4f8] sm:$0xff] }
  0xbf   : > { %v595_v50 = vpack.c.bf16 %v419_v46, %v411_v45 }
  0xc1   : > { %1597 = vmatmul.mubr.bf16.gmra.mrb[56].mxu1 %v628_v55  ;;  %v326_v55 = vld [vmem:[%s3522_s17 + $0x210] sm:$0xff] }
  0xc2   : > { %1983 = vmatmul.mubr.bf16.gmra.mrb[56].mxu0 %v632_v56  ;;  %1606 = vmatprep.mubr.bf16.mxu1 %v637_v57  ;;  %v334_v56 = vld [vmem:[%s3522_s17 + $0x250] sm:$0xff] }
  0xc3   : > { %1992 = vmatprep.mubr.bf16.mxu0 %v641_v58  ;;  %v330_v57 = vld [vmem:[%s3522_s17 + $0x230] sm:$0xff]  ;;  %v550_v63 = vpack.c.bf16 %v334_v56, %v326_v55  ;;  %v423_v55 = vld [vmem:[%s3522_s17 + $0x518] sm:$0xff] }
  0xc4   : > { %v338_v58 = vld [vmem:[%s3522_s17 + $0x270] sm:$0xff]  ;;  %v431_v56 = vld [vmem:[%s3522_s17 + $0x558] sm:$0xff] }
  0xc5   : > { %v554_v0 = vpack.c.bf16 %v338_v58, %v330_v57  ;;  %v427_v57 = vld [vmem:[%s3522_s17 + $0x538] sm:$0xff]  ;;  %v599_v61 = vpack.c.bf16 %v431_v56, %v423_v55 }
  0xc6   : > { %v435_v58 = vld [vmem:[%s3522_s17 + $0x578] sm:$0xff] }
  0xc7   : > { %v603_v62 = vpack.c.bf16 %v435_v58, %v427_v57 }
  0xc9   : > { %1607 = vmatmul.mubr.bf16.gmra.mrb[60].mxu1 %v636_v3  ;;  %v342_v3 = vld [vmem:[%s3522_s17 + $0x290] sm:$0xff] }
  0xca   : > { %1993 = vmatmul.mubr.bf16.gmra.mrb[60].mxu0 %v640_v4  ;;  %1649 = vmatprep.mubr.bf16.mxu1 %v519_v5  ;;  %v350_v4 = vld [vmem:[%s3522_s17 + $0x2d0] sm:$0xff] }
  0xcb   : > { %2035 = vmatprep.mubr.bf16.mxu0 %v523_v6  ;;  %v346_v5 = vld [vmem:[%s3522_s17 + $0x2b0] sm:$0xff]  ;;  %v558_v11 = vpack.c.bf16 %v350_v4, %v342_v3  ;;  %v439_v3 = vld [vmem:[%s3522_s17 + $0x598] sm:$0xff] }
  0xcc   : > { %v354_v6 = vld [vmem:[%s3522_s17 + $0x2f0] sm:$0xff]  ;;  %v447_v4 = vld [vmem:[%s3522_s17 + $0x5d8] sm:$0xff] }
  0xcd   : > { %v562_v12 = vpack.c.bf16 %v354_v6, %v346_v5  ;;  %v443_v5 = vld [vmem:[%s3522_s17 + $0x5b8] sm:$0xff]  ;;  %v607_v9 = vpack.c.bf16 %v447_v4, %v439_v3  ;;  %v772_v4 = vld [vmem:[%s4185_s2] sm:$0x3] }
  0xce   : > { %v451_v6 = vld [vmem:[%s3522_s17 + $0x5f8] sm:$0xff] }
  0xcf   : > { %v611_v10 = vpack.c.bf16 %v451_v6, %v443_v5 }
  0xd1   : > { %1650 = vmatmul.mubr.bf16.vlgmr.msra.gmra.mrb[0].mxu1 %v518_v15  ;;  %v358_v15 = vld [vmem:[%s3522_s17 + $0x310] sm:$0xff] }
  0xd2   : > { %2036 = vmatmul.mubr.bf16.vlgmr.msra.gmra.mrb[0].mxu0 %v522_v16  ;;  %1659 = vmatprep.mubr.bf16.mxu1 %v527_v17  ;;  %v366_v16 = vld [vmem:[%s3522_s17 + $0x350] sm:$0xff] }
  0xd3   : > { %2045 = vmatprep.mubr.bf16.mxu0 %v531_v18  ;;  %v362_v17 = vld [vmem:[%s3522_s17 + $0x330] sm:$0xff]  ;;  %v566_v23 = vpack.c.bf16 %v366_v16, %v358_v15  ;;  %v455_v15 = vld [vmem:[%s3522_s17 + $0x618] sm:$0xff] }
  0xd4   : > { %v370_v18 = vld [vmem:[%s3522_s17 + $0x370] sm:$0xff]  ;;  %v463_v16 = vld [vmem:[%s3522_s17 + $0x658] sm:$0xff] }
  0xd5   : > { %v570_v24 = vpack.c.bf16 %v370_v18, %v362_v17  ;;  %v459_v17 = vld [vmem:[%s3522_s17 + $0x638] sm:$0xff]  ;;  %v615_v21 = vpack.c.bf16 %v463_v16, %v455_v15 }
  0xd6   : > { %v467_v18 = vld [vmem:[%s3522_s17 + $0x678] sm:$0xff] }
  0xd7   : > { %v619_v22 = vpack.c.bf16 %v467_v18, %v459_v17 }
  0xd9   : > { %1660 = vmatmul.mubr.bf16.gmra.mrb[4].mxu1 %v526_v27  ;;  %v374_v27 = vld [vmem:[%s3522_s17 + $0x390] sm:$0xff] }
  0xda   : > { %2046 = vmatmul.mubr.bf16.gmra.mrb[4].mxu0 %v530_v28  ;;  %1669 = vmatprep.mubr.bf16.mxu1 %v535_v29  ;;  %v382_v28 = vld [vmem:[%s3522_s17 + $0x3d0] sm:$0xff] }
  0xdb   : > { %2055 = vmatprep.mubr.bf16.mxu0 %v539_v30  ;;  %v378_v29 = vld [vmem:[%s3522_s17 + $0x3b0] sm:$0xff]  ;;  %v574_v35 = vpack.c.bf16 %v382_v28, %v374_v27  ;;  %v471_v27 = vld [vmem:[%s3522_s17 + $0x698] sm:$0xff] }
  0xdc   : > { %v386_v30 = vld [vmem:[%s3522_s17 + $0x3f0] sm:$0xff]  ;;  %v479_v28 = vld [vmem:[%s3522_s17 + $0x6d8] sm:$0xff] }
  0xdd   : > { %v578_v36 = vpack.c.bf16 %v386_v30, %v378_v29  ;;  %v475_v29 = vld [vmem:[%s3522_s17 + $0x6b8] sm:$0xff]  ;;  %v623_v33 = vpack.c.bf16 %v479_v28, %v471_v27 }
  0xde   : > { %v483_v30 = vld [vmem:[%s3522_s17 + $0x6f8] sm:$0xff] }
  0xdf   : > { %v627_v34 = vpack.c.bf16 %v483_v30, %v475_v29 }
  0xe1   : > { %1670 = vmatmul.mubr.bf16.gmra.mrb[8].mxu1 %v534_v39  ;;  %v390_v39 = vld [vmem:[%s3522_s17 + $0x410] sm:$0xff] }
  0xe2   : > { %2056 = vmatmul.mubr.bf16.gmra.mrb[8].mxu0 %v538_v40  ;;  %1679 = vmatprep.mubr.bf16.mxu1 %v543_v41  ;;  %v398_v40 = vld [vmem:[%s3522_s17 + $0x450] sm:$0xff] }
  0xe3   : > { %2065 = vmatprep.mubr.bf16.mxu0 %v547_v42  ;;  %v394_v41 = vld [vmem:[%s3522_s17 + $0x430] sm:$0xff]  ;;  %v582_v47 = vpack.c.bf16 %v398_v40, %v390_v39  ;;  %v487_v39 = vld [vmem:[%s3522_s17 + $0x718] sm:$0xff] }
  0xe4   : > { %v402_v42 = vld [vmem:[%s3522_s17 + $0x470] sm:$0xff]  ;;  %v495_v40 = vld [vmem:[%s3522_s17 + $0x758] sm:$0xff] }
  0xe5   : > { %v586_v48 = vpack.c.bf16 %v402_v42, %v394_v41  ;;  %v491_v41 = vld [vmem:[%s3522_s17 + $0x738] sm:$0xff]  ;;  %v631_v45 = vpack.c.bf16 %v495_v40, %v487_v39 }
  0xe6   : > { %v499_v42 = vld [vmem:[%s3522_s17 + $0x778] sm:$0xff] }
  0xe7   : > { %v635_v46 = vpack.c.bf16 %v499_v42, %v491_v41  ;;  %v4057_v42 = vld.sshfl [vmem:[%s4186_s3] sm:$0x11 pattern:$0x75316420] }
  0xe9   : > { %1680 = vmatmul.mubr.bf16.gmra.mrb[12].mxu1 %v542_v51  ;;  %v406_v51 = vld [vmem:[%s3522_s17 + $0x490] sm:$0xff] }
  0xea   : > { %2066 = vmatmul.mubr.bf16.gmra.mrb[12].mxu0 %v546_v52  ;;  %1689 = vmatprep.mubr.bf16.mxu1 %v551_v53  ;;  %v414_v52 = vld [vmem:[%s3522_s17 + $0x4d0] sm:$0xff] }
  0xeb   : > { %2075 = vmatprep.mubr.bf16.mxu0 %v555_v54  ;;  %v410_v53 = vld [vmem:[%s3522_s17 + $0x4b0] sm:$0xff]  ;;  %v590_v59 = vpack.c.bf16 %v414_v52, %v406_v51  ;;  %v503_v51 = vld [vmem:[%s3522_s17 + $0x798] sm:$0xff] }
  0xec   : > { %v418_v54 = vld [vmem:[%s3522_s17 + $0x4f0] sm:$0xff]  ;;  %v511_v52 = vld [vmem:[%s3522_s17 + $0x7d8] sm:$0xff] }
  0xed   : > { %v594_v60 = vpack.c.bf16 %v418_v54, %v410_v53  ;;  %v507_v53 = vld [vmem:[%s3522_s17 + $0x7b8] sm:$0xff]  ;;  %v639_v57 = vpack.c.bf16 %v511_v52, %v503_v51 }
  0xee   : > { %v515_v54 = vld [vmem:[%s3522_s17 + $0x7f8] sm:$0xff] }
  0xef   : > { %v643_v58 = vpack.c.bf16 %v515_v54, %v507_v53 }
  0xf1   : > { %1690 = vmatmul.mubr.bf16.gmra.mrb[16].mxu1 %v550_v63  ;;  %v422_v63 = vld [vmem:[%s3522_s17 + $0x510] sm:$0xff] }
  0xf2   : > { %2076 = vmatmul.mubr.bf16.gmra.mrb[16].mxu0 %v554_v0  ;;  %1699 = vmatprep.mubr.bf16.mxu1 %v559_v1  ;;  %v430_v0 = vld [vmem:[%s3522_s17 + $0x550] sm:$0xff] }
  0xf3   : > { %2085 = vmatprep.mubr.bf16.mxu0 %v563_v2  ;;  %v426_v1 = vld [vmem:[%s3522_s17 + $0x530] sm:$0xff]  ;;  %v598_v7 = vpack.c.bf16 %v430_v0, %v422_v63 }
  0xf4   : > { %v434_v2 = vld [vmem:[%s3522_s17 + $0x570] sm:$0xff] }
  0xf5   : > { %v602_v8 = vpack.c.bf16 %v434_v2, %v426_v1  ;;  %v774_v1 = vlaneseq }
  0xf7   : > { %v4033_v2 = vshrl.u32 %v774_v1, 7  ;;  %vm2389_vm0 = vcmp.lt.s32.totalorder %v774_v1, 256 }
  0xf9   : > { %1700 = vmatmul.mubr.bf16.gmra.mrb[20].mxu1 %v558_v11  ;;  %v438_v11 = vld [vmem:[%s3522_s17 + $0x590] sm:$0xff]  ;;  %v776_v3 = vsub.s32 0, %v4033_v2  ;;  %v780_v5 = vsub.s32 1, %v4033_v2 }
  0xfa   : > { %2086 = vmatmul.mubr.bf16.gmra.mrb[20].mxu0 %v562_v12  ;;  %1709 = vmatprep.mubr.bf16.mxu1 %v567_v13  ;;  %v446_v12 = vld [vmem:[%s3522_s17 + $0x5d0] sm:$0xff] }
  0xfb   : > { %2095 = vmatprep.mubr.bf16.mxu0 %v571_v14  ;;  %v442_v13 = vld [vmem:[%s3522_s17 + $0x5b0] sm:$0xff]  ;;  %v606_v19 = vpack.c.bf16 %v446_v12, %v438_v11  ;;  %v4042_v6 = vrot.slane %v772_v4, %v776_v3 }
  0xfc   : > { %v450_v14 = vld [vmem:[%s3522_s17 + $0x5f0] sm:$0xff] }
  0xfd   : > { %v610_v20 = vpack.c.bf16 %v450_v14, %v442_v13 }
 0x101   : > { %1710 = vmatmul.mubr.bf16.gmra.mrb[24].mxu1 %v566_v23  ;;  %v454_v23 = vld [vmem:[%s3522_s17 + $0x610] sm:$0xff] }
 0x102   : > { %2096 = vmatmul.mubr.bf16.gmra.mrb[24].mxu0 %v570_v24  ;;  %1719 = vmatprep.mubr.bf16.mxu1 %v575_v25  ;;  %v462_v24 = vld [vmem:[%s3522_s17 + $0x650] sm:$0xff] }
 0x103   : > { %2105 = vmatprep.mubr.bf16.mxu0 %v579_v26  ;;  %v458_v25 = vld [vmem:[%s3522_s17 + $0x630] sm:$0xff]  ;;  %v614_v31 = vpack.c.bf16 %v462_v24, %v454_v23 }
 0x104   : > { %v466_v26 = vld [vmem:[%s3522_s17 + $0x670] sm:$0xff] }
 0x105   : > { %v618_v32 = vpack.c.bf16 %v466_v26, %v458_v25 }
 0x109   : > { %1720 = vmatmul.mubr.bf16.gmra.mrb[28].mxu1 %v574_v35  ;;  %v470_v35 = vld [vmem:[%s3522_s17 + $0x690] sm:$0xff] }
 0x10a   : > { %2106 = vmatmul.mubr.bf16.gmra.mrb[28].mxu0 %v578_v36  ;;  %1729 = vmatprep.mubr.bf16.mxu1 %v583_v37  ;;  %v478_v36 = vld [vmem:[%s3522_s17 + $0x6d0] sm:$0xff] }
 0x10b   : > { %2115 = vmatprep.mubr.bf16.mxu0 %v587_v38  ;;  %v474_v37 = vld [vmem:[%s3522_s17 + $0x6b0] sm:$0xff]  ;;  %v622_v43 = vpack.c.bf16 %v478_v36, %v470_v35 }
 0x10c   : > { %v482_v38 = vld [vmem:[%s3522_s17 + $0x6f0] sm:$0xff] }
 0x10d   : > { %v626_v44 = vpack.c.bf16 %v482_v38, %v474_v37  ;;  %v3298_v38 = vmov 1966171168  }
 0x10e   : > { %v2313_v39 = vunpack.c.l.s4 %v3298_v38 }
 0x111   : > { %1730 = vmatmul.mubr.bf16.gmra.mrb[32].mxu1 %v582_v47  ;;  %v486_v47 = vld [vmem:[%s3522_s17 + $0x710] sm:$0xff] }
 0x112   : > { %2116 = vmatmul.mubr.bf16.gmra.mrb[32].mxu0 %v586_v48  ;;  %1739 = vmatprep.mubr.bf16.mxu1 %v591_v49  ;;  %v494_v48 = vld [vmem:[%s3522_s17 + $0x750] sm:$0xff] }
 0x113   : > { %2125 = vmatprep.mubr.bf16.mxu0 %v595_v50  ;;  %v490_v49 = vld [vmem:[%s3522_s17 + $0x730] sm:$0xff]  ;;  %v630_v55 = vpack.c.bf16 %v494_v48, %v486_v47 }
 0x114   : > { %v498_v50 = vld [vmem:[%s3522_s17 + $0x770] sm:$0xff] }
 0x115   : > { %v634_v56 = vpack.c.bf16 %v498_v50, %v490_v49 }
 0x119   : > { %1740 = vmatmul.mubr.bf16.gmra.mrb[36].mxu1 %v590_v59  ;;  %v502_v59 = vld [vmem:[%s3522_s17 + $0x790] sm:$0xff] }
 0x11a   : > { %2126 = vmatmul.mubr.bf16.gmra.mrb[36].mxu0 %v594_v60  ;;  %1749 = vmatprep.mubr.bf16.mxu1 %v599_v61  ;;  %v510_v60 = vld [vmem:[%s3522_s17 + $0x7d0] sm:$0xff] }
 0x11b   : > { %2135 = vmatprep.mubr.bf16.mxu0 %v603_v62  ;;  %v506_v61 = vld [vmem:[%s3522_s17 + $0x7b0] sm:$0xff]  ;;  %v638_v63 = vpack.c.bf16 %v510_v60, %v502_v59 }
 0x11c   : > { %v514_v62 = vld [vmem:[%s3522_s17 + $0x7f0] sm:$0xff] }
 0x11d   : > { %v642_v0 = vpack.c.bf16 %v514_v62, %v506_v61 }
 0x121   : > { %1750 = vmatmul.mubr.bf16.gmra.mrb[40].mxu1 %v598_v7  ;;  %v4044_v7 = vrot.slane %v772_v4, %v780_v5 }
 0x122   : > { %2136 = vmatmul.mubr.bf16.gmra.mrb[40].mxu0 %v602_v8  ;;  %1759 = vmatprep.mubr.bf16.mxu1 %v607_v9 }
 0x123   : > { %2145 = vmatprep.mubr.bf16.mxu0 %v611_v10 }
 0x129   : > { %1760 = vmatmul.mubr.bf16.gmra.mrb[44].mxu1 %v606_v19 }
 0x12a   : > { %2146 = vmatmul.mubr.bf16.gmra.mrb[44].mxu0 %v610_v20  ;;  %1769 = vmatprep.mubr.bf16.mxu1 %v615_v21 }
 0x12b   : > { %2155 = vmatprep.mubr.bf16.mxu0 %v619_v22 }
 0x131   : > { %1770 = vmatmul.mubr.bf16.gmra.mrb[48].mxu1 %v614_v31 }
 0x132   : > { %2156 = vmatmul.mubr.bf16.gmra.mrb[48].mxu0 %v618_v32  ;;  %1779 = vmatprep.mubr.bf16.mxu1 %v623_v33 }
 0x133   : > { %2165 = vmatprep.mubr.bf16.mxu0 %v627_v34 }
 0x139   : > { %1780 = vmatmul.mubr.bf16.gmra.mrb[52].mxu1 %v622_v43  ;;  %v2314_v43 = vunpack.c.0.s8 %v2313_v39 }
 0x13a   : > { %2166 = vmatmul.mubr.bf16.gmra.mrb[52].mxu0 %v626_v44  ;;  %1789 = vmatprep.mubr.bf16.mxu1 %v631_v45  ;;  %v2311_v45 = vcombine.high %v4057_v42, %v4057_v42 }
 0x13b   : > { %2175 = vmatprep.mubr.bf16.mxu0 %v635_v46  ;;  %v4062_v49 = vsub.s32 %v2314_v43, %v4033_v2 }
 0x13d   : > { %v2325_v59 = vrot.slane %v2311_v45, %v4062_v49 }
 0x141   : > { %1790 = vmatmul.mubr.bf16.gmra.mrb[56].mxu1 %v630_v55 }
 0x142   : > { %2176 = vmatmul.mubr.bf16.gmra.mrb[56].mxu0 %v634_v56  ;;  %1799 = vmatprep.mubr.bf16.mxu1 %v639_v57 }
 0x143   : > { %2185 = vmatprep.mubr.bf16.mxu0 %v643_v58 }
 0x149   : > { %1800 = vmatmul.mubr.bf16.gmra.mrb[60].mxu1 %v638_v63 }
 0x14a   : > { %2186 = vmatmul.mubr.bf16.gmra.mrb[60].mxu0 %v642_v0  ;;  %2360 = vmatprep.mubr.bf16.mxu1 %v2325_v59 }
 0x1a4   : > { %v1651_v8 = vpop.f32.mrb[0].mxu1 }
 0x1a5   : > { %v2037_v9 = vpop.f32.mrb[0].mxu0  ;;  %v2617_v10 = vadd.f32 %v1651_v8, %v4042_v6  ;;  %v1653_v11 = vpop.f32.mrb[1].mxu1 }
 0x1a6   : > { %v2039_v12 = vpop.f32.mrb[1].mxu0  ;;  %v2619_v13 = vadd.f32 %v1653_v11, %v4044_v7  ;;  %v1655_v14 = vpop.f32.mrb[2].mxu1  ;;  %v3299_v11 = vmov 0  }
 0x1a7   : > { %v2041_v15 = vpop.f32.mrb[2].mxu0  ;;  %v2618_v16 = vadd.f32 %v2617_v10, %v2037_v9  ;;  %v2621_v17 = vadd.f32 %v1655_v14, %v4042_v6  ;;  %v1657_v18 = vpop.f32.mrb[3].mxu1  ;;  %v2293_v9 = vld [vmem:[#allocation2] sm:$0x1]  ;;  %2913 = vset.pattern.permute.xlu0 %v3299_v11 }
 0x1a8   : > { %v2043_v19 = vpop.f32.mrb[3].mxu0  ;;  %v2620_v20 = vadd.f32 %v2619_v13, %v2039_v12  ;;  %v2623_v21 = vadd.f32 %v1657_v18, %v4044_v7  ;;  %2296 = vperm.xlu0 %2913, %v2293_v9  }
 0x1a9   : > { %3106 = vtanh.f32 %v2618_v16  ;;  %v2622_v22 = vadd.f32 %v2621_v17, %v2041_v15 }
 0x1aa   : > { %3108 = vtanh.f32 %v2620_v20  ;;  %v2624_v23 = vadd.f32 %v2623_v21, %v2043_v19 }
 0x1ab   : > { %3110 = vtanh.f32 %v2622_v22 }
 0x1ac   : > { %3112 = vtanh.f32 %v2624_v23  ;;  %v1661_v24 = vpop.f32.mrb[4].mxu1 }
 0x1ad   : > { %v2047_v25 = vpop.f32.mrb[4].mxu0  ;;  %v2625_v26 = vadd.f32 %v1661_v24, %v4042_v6  ;;  %v1663_v27 = vpop.f32.mrb[5].mxu1 }
 0x1ae   : > { %v2049_v28 = vpop.f32.mrb[5].mxu0  ;;  %v2627_v29 = vadd.f32 %v1663_v27, %v4044_v7  ;;  %v1665_v30 = vpop.f32.mrb[6].mxu1 }
 0x1af   : > { %v2051_v31 = vpop.f32.mrb[6].mxu0  ;;  %v2626_v32 = vadd.f32 %v2625_v26, %v2047_v25  ;;  %v2629_v33 = vadd.f32 %v1665_v30, %v4042_v6  ;;  %v1667_v34 = vpop.f32.mrb[7].mxu1 }
 0x1b0   : > { %v2053_v35 = vpop.f32.mrb[7].mxu0  ;;  %v2628_v36 = vadd.f32 %v2627_v29, %v2049_v28  ;;  %v2631_v37 = vadd.f32 %v1667_v34, %v4044_v7 }
 0x1b1   : > { %3114 = vtanh.f32 %v2626_v32  ;;  %v2630_v40 = vadd.f32 %v2629_v33, %v2051_v31 }
 0x1b2   : > { %3116 = vtanh.f32 %v2628_v36  ;;  %v2632_v41 = vadd.f32 %v2631_v37, %v2053_v35 }
 0x1b3   : > { %v3107_v44 = vpop.eup %3106  ;;  %3118 = vtanh.f32 %v2630_v40 }
 0x1b4   : > { %v3109_v46 = vpop.eup %3108  ;;  %3120 = vtanh.f32 %v2632_v41  ;;  %v1671_v47 = vpop.f32.mrb[8].mxu1 }
 0x1b5   : > { %v2057_v48 = vpop.f32.mrb[8].mxu0  ;;  %v3111_v50 = vpop.eup %3110  ;;  %v2633_v51 = vadd.f32 %v1671_v47, %v4042_v6 }
 0x1b6   : > { %v1673_v52 = vpop.f32.mrb[9].mxu1  ;;  %v2059_v53 = vpop.f32.mrb[9].mxu0  ;;  %v2261_v58 = vpack.c.bf16 %v3111_v50, %v3107_v44 }
 0x1b7   : > { %v3113_v54 = vpop.eup %3112  ;;  %v2635_v55 = vadd.f32 %v1673_v52, %v4044_v7  ;;  %v1675_v56 = vpop.f32.mrb[10].mxu1  ;;  %v2634_v60 = vadd.f32 %v2633_v51, %v2057_v48 }
 0x1b8   : > { %v2061_v57 = vpop.f32.mrb[10].mxu0  ;;  %v2637_v61 = vadd.f32 %v1675_v56, %v4042_v6  ;;  %v1677_v62 = vpop.f32.mrb[11].mxu1  ;;  %v2262_v0 = vpack.c.bf16 %v3113_v54, %v3109_v46 }
 0x1b9   : > { %v2063_v63 = vpop.f32.mrb[11].mxu0  ;;  %v2636_v4 = vadd.f32 %v2635_v55, %v2059_v53  ;;  %v2639_v5 = vadd.f32 %v1677_v62, %v4044_v7  ;;  %3122 = vtanh.f32 %v2634_v60 }
 0x1ba   : > { %v2638_v8 = vadd.f32 %v2637_v61, %v2061_v57  ;;  %2328 = vmatprep.subr.bf16.mxu1 %v2262_v0 }
 0x1bb   : > { %3124 = vtanh.f32 %v2636_v4  ;;  %v2640_v10 = vadd.f32 %v2639_v5, %v2063_v63  ;;  %2329 = vmatpush1.bf16.xpose.msra.mxu1 %v2261_v58  ;;  %v3115_v12 = vpop.eup %3114 }
 0x1bc   : > { %3126 = vtanh.f32 %v2638_v8  ;;  %v3117_v13 = vpop.eup %3116  ;;  %v1681_v14 = vpop.f32.mrb[12].mxu1 }
 0x1bd   : > { %3128 = vtanh.f32 %v2640_v10  ;;  %v2067_v15 = vpop.f32.mrb[12].mxu0  ;;  %v3119_v16 = vpop.eup %3118  ;;  %v2641_v17 = vadd.f32 %v1681_v14, %v4042_v6 }
 0x1be   : > { %v1683_v18 = vpop.f32.mrb[13].mxu1  ;;  %v2069_v19 = vpop.f32.mrb[13].mxu0  ;;  %v2263_v24 = vpack.c.bf16 %v3119_v16, %v3115_v12 }
 0x1bf   : > { %v3121_v20 = vpop.eup %3120  ;;  %v2643_v21 = vadd.f32 %v1683_v18, %v4044_v7  ;;  %v1685_v22 = vpop.f32.mrb[14].mxu1  ;;  %v2642_v25 = vadd.f32 %v2641_v17, %v2067_v15 }
 0x1c0   : > { %v2071_v23 = vpop.f32.mrb[14].mxu0  ;;  %v2645_v26 = vadd.f32 %v1685_v22, %v4042_v6  ;;  %v1687_v27 = vpop.f32.mrb[15].mxu1  ;;  %v2264_v29 = vpack.c.bf16 %v3121_v20, %v3117_v13 }
 0x1c1   : > { %v2073_v28 = vpop.f32.mrb[15].mxu0  ;;  %v2644_v30 = vadd.f32 %v2643_v21, %v2069_v19  ;;  %v2647_v31 = vadd.f32 %v1687_v27, %v4044_v7  ;;  %3130 = vtanh.f32 %v2642_v25 }
 0x1c2   : > { %v2646_v32 = vadd.f32 %v2645_v26, %v2071_v23  ;;  %2330 = vmatprep.subr.bf16.mxu1 %v2264_v29 }
 0x1c3   : > { %3132 = vtanh.f32 %v2644_v30  ;;  %v2648_v33 = vadd.f32 %v2647_v31, %v2073_v28  ;;  %2331 = vmatpush1.bf16.xpose.msra.mxu1 %v2263_v24  ;;  %v3123_v34 = vpop.eup %3122 }
 0x1c4   : > { %3134 = vtanh.f32 %v2646_v32  ;;  %v1691_v36 = vpop.f32.mrb[16].mxu1 }
 0x1c5   : > { %v3125_v35 = vpop.eup %3124  ;;  %3136 = vtanh.f32 %v2648_v33  ;;  %v2077_v37 = vpop.f32.mrb[16].mxu0  ;;  %v2649_v39 = vadd.f32 %v1691_v36, %v4042_v6 }
 0x1c6   : > { %v3127_v38 = vpop.eup %3126  ;;  %v1693_v40 = vpop.f32.mrb[17].mxu1 }
 0x1c7   : > { %v2079_v41 = vpop.f32.mrb[17].mxu0  ;;  %v3129_v43 = vpop.eup %3128  ;;  %v2651_v44 = vadd.f32 %v1693_v40, %v4044_v7  ;;  %v2265_v47 = vpack.c.bf16 %v3127_v38, %v3123_v34  ;;  %v2650_v48 = vadd.f32 %v2649_v39, %v2077_v37 }
 0x1c8   : > { %v1695_v45 = vpop.f32.mrb[18].mxu1  ;;  %v2081_v46 = vpop.f32.mrb[18].mxu0  ;;  %v2266_v53 = vpack.c.bf16 %v3129_v43, %v3125_v35 }
 0x1c9   : > { %v2653_v50 = vadd.f32 %v1695_v45, %v4042_v6  ;;  %v1697_v51 = vpop.f32.mrb[19].mxu1  ;;  %v2083_v52 = vpop.f32.mrb[19].mxu0  ;;  %v2652_v54 = vadd.f32 %v2651_v44, %v2079_v41  ;;  %3138 = vtanh.f32 %v2650_v48 }
 0x1ca   : > { %v2655_v55 = vadd.f32 %v1697_v51, %v4044_v7  ;;  %2332 = vmatprep.subr.bf16.mxu1 %v2266_v53 }
 0x1cb   : > { %v2654_v56 = vadd.f32 %v2653_v50, %v2081_v46  ;;  %3140 = vtanh.f32 %v2652_v54  ;;  %2333 = vmatpush1.bf16.xpose.msra.mxu1 %v2265_v47  ;;  %v3131_v58 = vpop.eup %3130 }
 0x1cc   : > { %v2656_v57 = vadd.f32 %v2655_v55, %v2083_v52  ;;  %v1701_v60 = vpop.f32.mrb[20].mxu1 }
 0x1cd   : > { %3142 = vtanh.f32 %v2654_v56  ;;  %v3133_v59 = vpop.eup %3132  ;;  %v2087_v61 = vpop.f32.mrb[20].mxu0  ;;  %v2657_v63 = vadd.f32 %v1701_v60, %v4042_v6 }
 0x1ce   : > { %3144 = vtanh.f32 %v2656_v57  ;;  %v3135_v62 = vpop.eup %3134  ;;  %v1703_v0 = vpop.f32.mrb[21].mxu1 }
 0x1cf   : > { %v2089_v4 = vpop.f32.mrb[21].mxu0  ;;  %v3137_v5 = vpop.eup %3136  ;;  %v2659_v8 = vadd.f32 %v1703_v0, %v4044_v7  ;;  %v2267_v11 = vpack.c.bf16 %v3135_v62, %v3131_v58  ;;  %v2658_v12 = vadd.f32 %v2657_v63, %v2087_v61 }
 0x1d0   : > { %v1705_v9 = vpop.f32.mrb[22].mxu1  ;;  %v2091_v10 = vpop.f32.mrb[22].mxu0  ;;  %v2268_v16 = vpack.c.bf16 %v3137_v5, %v3133_v59 }
 0x1d1   : > { %v2661_v13 = vadd.f32 %v1705_v9, %v4042_v6  ;;  %v1707_v14 = vpop.f32.mrb[23].mxu1  ;;  %v2093_v15 = vpop.f32.mrb[23].mxu0  ;;  %v2660_v17 = vadd.f32 %v2659_v8, %v2089_v4  ;;  %3146 = vtanh.f32 %v2658_v12 }
 0x1d2   : > { %v2663_v18 = vadd.f32 %v1707_v14, %v4044_v7  ;;  %2334 = vmatprep.subr.bf16.mxu1 %v2268_v16 }
 0x1d3   : > { %v2662_v19 = vadd.f32 %v2661_v13, %v2091_v10  ;;  %3148 = vtanh.f32 %v2660_v17  ;;  %2335 = vmatpush1.bf16.xpose.msra.mxu1 %v2267_v11  ;;  %v3139_v21 = vpop.eup %3138 }
 0x1d4   : > { %v2664_v20 = vadd.f32 %v2663_v18, %v2093_v15  ;;  %v1711_v23 = vpop.f32.mrb[24].mxu1 }
 0x1d5   : > { %3150 = vtanh.f32 %v2662_v19  ;;  %v3141_v22 = vpop.eup %3140  ;;  %v2097_v24 = vpop.f32.mrb[24].mxu0  ;;  %v2665_v26 = vadd.f32 %v1711_v23, %v4042_v6 }
 0x1d6   : > { %3152 = vtanh.f32 %v2664_v20  ;;  %v1713_v27 = vpop.f32.mrb[25].mxu1  ;;  %v2099_v28 = vpop.f32.mrb[25].mxu0 }
 0x1d7   : > { %v3143_v25 = vpop.eup %3142  ;;  %v2667_v30 = vadd.f32 %v1713_v27, %v4044_v7  ;;  %v1715_v31 = vpop.f32.mrb[26].mxu1  ;;  %v2666_v34 = vadd.f32 %v2665_v26, %v2097_v24 }
 0x1d8   : > { %v3145_v29 = vpop.eup %3144  ;;  %v2101_v32 = vpop.f32.mrb[26].mxu0  ;;  %v2269_v33 = vpack.c.bf16 %v3143_v25, %v3139_v21  ;;  %v2669_v35 = vadd.f32 %v1715_v31, %v4042_v6 }
 0x1d9   : > { %v1717_v36 = vpop.f32.mrb[27].mxu1  ;;  %v2103_v37 = vpop.f32.mrb[27].mxu0  ;;  %v2270_v38 = vpack.c.bf16 %v3145_v29, %v3141_v22  ;;  %v2668_v39 = vadd.f32 %v2667_v30, %v2099_v28  ;;  %3154 = vtanh.f32 %v2666_v34 }
 0x1da   : > { %v2671_v40 = vadd.f32 %v1717_v36, %v4044_v7  ;;  %v2670_v41 = vadd.f32 %v2669_v35, %v2101_v32 }
 0x1db   : > { %2336 = vmatprep.subr.bf16.mxu1 %v2270_v38  ;;  %3156 = vtanh.f32 %v2668_v39  ;;  %v3147_v44 = vpop.eup %3146 }
 0x1dc   : > { %v2672_v43 = vadd.f32 %v2671_v40, %v2103_v37  ;;  %2337 = vmatpush1.bf16.xpose.msra.mxu1 %v2269_v33  ;;  %3158 = vtanh.f32 %v2670_v41  ;;  %v1721_v46 = vpop.f32.mrb[28].mxu1 }
 0x1dd   : > { %v3149_v45 = vpop.eup %3148  ;;  %v2107_v47 = vpop.f32.mrb[28].mxu0  ;;  %v2673_v50 = vadd.f32 %v1721_v46, %v4042_v6 }
 0x1de   : > { %3160 = vtanh.f32 %v2672_v43  ;;  %v1723_v51 = vpop.f32.mrb[29].mxu1  ;;  %v2109_v52 = vpop.f32.mrb[29].mxu0 }
 0x1df   : > { %v3151_v48 = vpop.eup %3150  ;;  %v2675_v54 = vadd.f32 %v1723_v51, %v4044_v7  ;;  %v1725_v55 = vpop.f32.mrb[30].mxu1  ;;  %v2674_v58 = vadd.f32 %v2673_v50, %v2107_v47 }
 0x1e0   : > { %v3153_v53 = vpop.eup %3152  ;;  %v2111_v56 = vpop.f32.mrb[30].mxu0  ;;  %v2271_v57 = vpack.c.bf16 %v3151_v48, %v3147_v44  ;;  %v2677_v59 = vadd.f32 %v1725_v55, %v4042_v6 }
 0x1e1   : > { %v1727_v60 = vpop.f32.mrb[31].mxu1  ;;  %v2113_v61 = vpop.f32.mrb[31].mxu0  ;;  %v2272_v62 = vpack.c.bf16 %v3153_v53, %v3149_v45  ;;  %v2676_v63 = vadd.f32 %v2675_v54, %v2109_v52  ;;  %3162 = vtanh.f32 %v2674_v58 }
 0x1e2   : > { %v2679_v0 = vadd.f32 %v1727_v60, %v4044_v7  ;;  %v2678_v4 = vadd.f32 %v2677_v59, %v2111_v56 }
 0x1e3   : > { %2338 = vmatprep.subr.bf16.mxu1 %v2272_v62  ;;  %3164 = vtanh.f32 %v2676_v63  ;;  %v3155_v8 = vpop.eup %3154 }
 0x1e4   : > { %v2680_v5 = vadd.f32 %v2679_v0, %v2113_v61  ;;  %2339 = vmatpush1.bf16.xpose.msra.mxu1 %v2271_v57  ;;  %3166 = vtanh.f32 %v2678_v4  ;;  %v1731_v10 = vpop.f32.mrb[32].mxu1 }
 0x1e5   : > { %v3157_v9 = vpop.eup %3156  ;;  %v2117_v11 = vpop.f32.mrb[32].mxu0  ;;  %v2681_v13 = vadd.f32 %v1731_v10, %v4042_v6 }
 0x1e6   : > { %3168 = vtanh.f32 %v2680_v5  ;;  %v3159_v12 = vpop.eup %3158  ;;  %v1733_v14 = vpop.f32.mrb[33].mxu1 }
 0x1e7   : > { %v2119_v15 = vpop.f32.mrb[33].mxu0  ;;  %v2683_v17 = vadd.f32 %v1733_v14, %v4044_v7  ;;  %v1735_v18 = vpop.f32.mrb[34].mxu1  ;;  %v2273_v20 = vpack.c.bf16 %v3159_v12, %v3155_v8  ;;  %v2682_v21 = vadd.f32 %v2681_v13, %v2117_v11 }
 0x1e8   : > { %v3161_v16 = vpop.eup %3160  ;;  %v2121_v19 = vpop.f32.mrb[34].mxu0  ;;  %v2685_v22 = vadd.f32 %v1735_v18, %v4042_v6 }
 0x1e9   : > { %v1737_v23 = vpop.f32.mrb[35].mxu1  ;;  %v2123_v24 = vpop.f32.mrb[35].mxu0  ;;  %v2274_v25 = vpack.c.bf16 %v3161_v16, %v3157_v9  ;;  %v2684_v26 = vadd.f32 %v2683_v17, %v2119_v15  ;;  %3170 = vtanh.f32 %v2682_v21 }
 0x1ea   : > { %v2687_v27 = vadd.f32 %v1737_v23, %v4044_v7  ;;  %v2686_v28 = vadd.f32 %v2685_v22, %v2121_v19 }
 0x1eb   : > { %2340 = vmatprep.subr.bf16.mxu1 %v2274_v25  ;;  %3172 = vtanh.f32 %v2684_v26  ;;  %v3163_v30 = vpop.eup %3162 }
 0x1ec   : > { %v2688_v29 = vadd.f32 %v2687_v27, %v2123_v24  ;;  %2341 = vmatpush1.bf16.xpose.msra.mxu1 %v2273_v20  ;;  %3174 = vtanh.f32 %v2686_v28  ;;  %v1741_v32 = vpop.f32.mrb[36].mxu1 }
 0x1ed   : > { %v3165_v31 = vpop.eup %3164  ;;  %v2127_v33 = vpop.f32.mrb[36].mxu0  ;;  %v2689_v35 = vadd.f32 %v1741_v32, %v4042_v6 }
 0x1ee   : > { %3176 = vtanh.f32 %v2688_v29  ;;  %v3167_v34 = vpop.eup %3166  ;;  %v1743_v36 = vpop.f32.mrb[37].mxu1 }
 0x1ef   : > { %v2129_v37 = vpop.f32.mrb[37].mxu0  ;;  %v2691_v39 = vadd.f32 %v1743_v36, %v4044_v7  ;;  %v1745_v40 = vpop.f32.mrb[38].mxu1  ;;  %v2275_v43 = vpack.c.bf16 %v3167_v34, %v3163_v30  ;;  %v2690_v44 = vadd.f32 %v2689_v35, %v2127_v33 }
 0x1f0   : > { %v3169_v38 = vpop.eup %3168  ;;  %v2131_v41 = vpop.f32.mrb[38].mxu0  ;;  %v2693_v45 = vadd.f32 %v1745_v40, %v4042_v6 }
 0x1f1   : > { %v1747_v46 = vpop.f32.mrb[39].mxu1  ;;  %v2133_v47 = vpop.f32.mrb[39].mxu0  ;;  %v2276_v48 = vpack.c.bf16 %v3169_v38, %v3165_v31  ;;  %v2692_v50 = vadd.f32 %v2691_v39, %v2129_v37  ;;  %3178 = vtanh.f32 %v2690_v44 }
 0x1f2   : > { %v2695_v51 = vadd.f32 %v1747_v46, %v4044_v7  ;;  %v2694_v52 = vadd.f32 %v2693_v45, %v2131_v41 }
 0x1f3   : > { %2342 = vmatprep.subr.bf16.mxu1 %v2276_v48  ;;  %3180 = vtanh.f32 %v2692_v50  ;;  %v3171_v54 = vpop.eup %3170 }
 0x1f4   : > { %v2696_v53 = vadd.f32 %v2695_v51, %v2133_v47  ;;  %2343 = vmatpush1.bf16.xpose.msra.mxu1 %v2275_v43  ;;  %3182 = vtanh.f32 %v2694_v52  ;;  %v1751_v56 = vpop.f32.mrb[40].mxu1 }
 0x1f5   : > { %v3173_v55 = vpop.eup %3172  ;;  %v2137_v57 = vpop.f32.mrb[40].mxu0  ;;  %v2697_v59 = vadd.f32 %v1751_v56, %v4042_v6 }
 0x1f6   : > { %3184 = vtanh.f32 %v2696_v53  ;;  %v3175_v58 = vpop.eup %3174  ;;  %v1753_v60 = vpop.f32.mrb[41].mxu1 }
 0x1f7   : > { %v2139_v61 = vpop.f32.mrb[41].mxu0  ;;  %v2699_v63 = vadd.f32 %v1753_v60, %v4044_v7  ;;  %v1755_v0 = vpop.f32.mrb[42].mxu1  ;;  %v2277_v5 = vpack.c.bf16 %v3175_v58, %v3171_v54  ;;  %v2698_v8 = vadd.f32 %v2697_v59, %v2137_v57 }
 0x1f8   : > { %v3177_v62 = vpop.eup %3176  ;;  %v2141_v4 = vpop.f32.mrb[42].mxu0  ;;  %v2701_v9 = vadd.f32 %v1755_v0, %v4042_v6 }
 0x1f9   : > { %v1757_v10 = vpop.f32.mrb[43].mxu1  ;;  %v2143_v11 = vpop.f32.mrb[43].mxu0  ;;  %v2278_v12 = vpack.c.bf16 %v3177_v62, %v3173_v55  ;;  %v2700_v13 = vadd.f32 %v2699_v63, %v2139_v61  ;;  %3186 = vtanh.f32 %v2698_v8 }
 0x1fa   : > { %v2703_v14 = vadd.f32 %v1757_v10, %v4044_v7  ;;  %v2702_v15 = vadd.f32 %v2701_v9, %v2141_v4 }
 0x1fb   : > { %2344 = vmatprep.subr.bf16.mxu1 %v2278_v12  ;;  %3188 = vtanh.f32 %v2700_v13  ;;  %v3179_v17 = vpop.eup %3178 }
 0x1fc   : > { %v2704_v16 = vadd.f32 %v2703_v14, %v2143_v11  ;;  %2345 = vmatpush1.bf16.xpose.msra.mxu1 %v2277_v5  ;;  %3190 = vtanh.f32 %v2702_v15  ;;  %v1761_v19 = vpop.f32.mrb[44].mxu1 }
 0x1fd   : > { %v3181_v18 = vpop.eup %3180  ;;  %v2147_v20 = vpop.f32.mrb[44].mxu0  ;;  %v2705_v22 = vadd.f32 %v1761_v19, %v4042_v6 }
 0x1fe   : > { %3192 = vtanh.f32 %v2704_v16  ;;  %v3183_v21 = vpop.eup %3182  ;;  %v1763_v23 = vpop.f32.mrb[45].mxu1 }
 0x1ff   : > { %v2149_v24 = vpop.f32.mrb[45].mxu0  ;;  %v2707_v26 = vadd.f32 %v1763_v23, %v4044_v7  ;;  %v1765_v27 = vpop.f32.mrb[46].mxu1  ;;  %v2279_v29 = vpack.c.bf16 %v3183_v21, %v3179_v17  ;;  %v2706_v30 = vadd.f32 %v2705_v22, %v2147_v20 }
 0x200   : > { %v3185_v25 = vpop.eup %3184  ;;  %v2151_v28 = vpop.f32.mrb[46].mxu0  ;;  %v2709_v31 = vadd.f32 %v1765_v27, %v4042_v6 }
 0x201   : > { %v1767_v32 = vpop.f32.mrb[47].mxu1  ;;  %v2153_v33 = vpop.f32.mrb[47].mxu0  ;;  %v2280_v34 = vpack.c.bf16 %v3185_v25, %v3181_v18  ;;  %v2708_v35 = vadd.f32 %v2707_v26, %v2149_v24  ;;  %3194 = vtanh.f32 %v2706_v30 }
 0x202   : > { %v2711_v36 = vadd.f32 %v1767_v32, %v4044_v7  ;;  %v2710_v37 = vadd.f32 %v2709_v31, %v2151_v28 }
 0x203   : > { %2346 = vmatprep.subr.bf16.mxu1 %v2280_v34  ;;  %3196 = vtanh.f32 %v2708_v35  ;;  %v3187_v39 = vpop.eup %3186 }
 0x204   : > { %v2712_v38 = vadd.f32 %v2711_v36, %v2153_v33  ;;  %2347 = vmatpush1.bf16.xpose.msra.mxu1 %v2279_v29  ;;  %3198 = vtanh.f32 %v2710_v37  ;;  %v1771_v41 = vpop.f32.mrb[48].mxu1 }
 0x205   : > { %v3189_v40 = vpop.eup %3188  ;;  %v2157_v43 = vpop.f32.mrb[48].mxu0  ;;  %v2713_v45 = vadd.f32 %v1771_v41, %v4042_v6 }
 0x206   : > { %3200 = vtanh.f32 %v2712_v38  ;;  %v3191_v44 = vpop.eup %3190  ;;  %v1773_v46 = vpop.f32.mrb[49].mxu1 }
 0x207   : > { %v2159_v47 = vpop.f32.mrb[49].mxu0  ;;  %v2715_v50 = vadd.f32 %v1773_v46, %v4044_v7  ;;  %v1775_v51 = vpop.f32.mrb[50].mxu1  ;;  %v2281_v53 = vpack.c.bf16 %v3191_v44, %v3187_v39  ;;  %v2714_v54 = vadd.f32 %v2713_v45, %v2157_v43 }
 0x208   : > { %v3193_v48 = vpop.eup %3192  ;;  %v2161_v52 = vpop.f32.mrb[50].mxu0  ;;  %v2717_v55 = vadd.f32 %v1775_v51, %v4042_v6 }
 0x209   : > { %v1777_v56 = vpop.f32.mrb[51].mxu1  ;;  %v2163_v57 = vpop.f32.mrb[51].mxu0  ;;  %v2282_v58 = vpack.c.bf16 %v3193_v48, %v3189_v40  ;;  %v2716_v59 = vadd.f32 %v2715_v50, %v2159_v47  ;;  %3202 = vtanh.f32 %v2714_v54 }
 0x20a   : > { %v2719_v60 = vadd.f32 %v1777_v56, %v4044_v7  ;;  %v2718_v61 = vadd.f32 %v2717_v55, %v2161_v52 }
 0x20b   : > { %2348 = vmatprep.subr.bf16.mxu1 %v2282_v58  ;;  %3204 = vtanh.f32 %v2716_v59  ;;  %v3195_v63 = vpop.eup %3194 }
 0x20c   : > { %v2720_v62 = vadd.f32 %v2719_v60, %v2163_v57  ;;  %2349 = vmatpush1.bf16.xpose.msra.mxu1 %v2281_v53  ;;  %3206 = vtanh.f32 %v2718_v61  ;;  %v1781_v4 = vpop.f32.mrb[52].mxu1 }
 0x20d   : > { %v3197_v0 = vpop.eup %3196  ;;  %v2167_v5 = vpop.f32.mrb[52].mxu0  ;;  %v2721_v9 = vadd.f32 %v1781_v4, %v4042_v6 }
 0x20e   : > { %3208 = vtanh.f32 %v2720_v62  ;;  %v3199_v8 = vpop.eup %3198  ;;  %v1783_v10 = vpop.f32.mrb[53].mxu1 }
 0x20f   : > { %v2169_v11 = vpop.f32.mrb[53].mxu0  ;;  %v2723_v13 = vadd.f32 %v1783_v10, %v4044_v7  ;;  %v1785_v14 = vpop.f32.mrb[54].mxu1  ;;  %v2283_v16 = vpack.c.bf16 %v3199_v8, %v3195_v63  ;;  %v2722_v17 = vadd.f32 %v2721_v9, %v2167_v5 }
 0x210   : > { %v3201_v12 = vpop.eup %3200  ;;  %v2171_v15 = vpop.f32.mrb[54].mxu0  ;;  %v2725_v18 = vadd.f32 %v1785_v14, %v4042_v6 }
 0x211   : > { %v1787_v19 = vpop.f32.mrb[55].mxu1  ;;  %v2173_v20 = vpop.f32.mrb[55].mxu0  ;;  %v2284_v21 = vpack.c.bf16 %v3201_v12, %v3197_v0  ;;  %v2724_v22 = vadd.f32 %v2723_v13, %v2169_v11  ;;  %3210 = vtanh.f32 %v2722_v17 }
 0x212   : > { %v2727_v23 = vadd.f32 %v1787_v19, %v4044_v7  ;;  %v2726_v24 = vadd.f32 %v2725_v18, %v2171_v15 }
 0x213   : > { %2350 = vmatprep.subr.bf16.mxu1 %v2284_v21  ;;  %3212 = vtanh.f32 %v2724_v22  ;;  %v3203_v26 = vpop.eup %3202 }
 0x214   : > { %v2728_v25 = vadd.f32 %v2727_v23, %v2173_v20  ;;  %2351 = vmatpush1.bf16.xpose.msra.mxu1 %v2283_v16  ;;  %3214 = vtanh.f32 %v2726_v24  ;;  %v1791_v28 = vpop.f32.mrb[56].mxu1  ;;  %v2318_v23 = vrot.slane %v4057_v42, %v4062_v49 }
 0x215   : > { %v3205_v27 = vpop.eup %3204  ;;  %v2177_v29 = vpop.f32.mrb[56].mxu0  ;;  %v2729_v31 = vadd.f32 %v1791_v28, %v4042_v6 }
 0x216   : > { %3216 = vtanh.f32 %v2728_v25  ;;  %v3207_v30 = vpop.eup %3206  ;;  %v1793_v32 = vpop.f32.mrb[57].mxu1 }
 0x217   : > { %v2179_v33 = vpop.f32.mrb[57].mxu0  ;;  %v2731_v35 = vadd.f32 %v1793_v32, %v4044_v7  ;;  %v1795_v36 = vpop.f32.mrb[58].mxu1  ;;  %v2285_v38 = vpack.c.bf16 %v3207_v30, %v3203_v26  ;;  %v2730_v39 = vadd.f32 %v2729_v31, %v2177_v29 }
 0x218   : > { %v3209_v34 = vpop.eup %3208  ;;  %v2181_v37 = vpop.f32.mrb[58].mxu0  ;;  %v2733_v40 = vadd.f32 %v1795_v36, %v4042_v6 }
 0x219   : > { %v1797_v41 = vpop.f32.mrb[59].mxu1  ;;  %v2183_v43 = vpop.f32.mrb[59].mxu0  ;;  %v2286_v44 = vpack.c.bf16 %v3209_v34, %v3205_v27  ;;  %v2732_v45 = vadd.f32 %v2731_v35, %v2179_v33  ;;  %3218 = vtanh.f32 %v2730_v39 }
 0x21a   : > { %v2735_v46 = vadd.f32 %v1797_v41, %v4044_v7  ;;  %v2734_v47 = vadd.f32 %v2733_v40, %v2181_v37 }
 0x21b   : > { %2352 = vmatprep.subr.bf16.mxu1 %v2286_v44  ;;  %3220 = vtanh.f32 %v2732_v45  ;;  %v3211_v50 = vpop.eup %3210 }
 0x21c   : > { %v2736_v48 = vadd.f32 %v2735_v46, %v2183_v43  ;;  %2353 = vmatpush1.bf16.xpose.msra.mxu1 %v2285_v38  ;;  %3222 = vtanh.f32 %v2734_v47  ;;  %v1801_v52 = vpop.f32.mrb[60].mxu1 }
 0x21d   : > { %v3213_v51 = vpop.eup %3212  ;;  %v2187_v53 = vpop.f32.mrb[60].mxu0  ;;  %v2737_v55 = vadd.f32 %v1801_v52, %v4042_v6 }
 0x21e   : > { %3224 = vtanh.f32 %v2736_v48  ;;  %v3215_v54 = vpop.eup %3214  ;;  %v1803_v56 = vpop.f32.mrb[61].mxu1 }
 0x21f   : > { %v2189_v57 = vpop.f32.mrb[61].mxu0  ;;  %v2739_v59 = vadd.f32 %v1803_v56, %v4044_v7  ;;  %v1805_v60 = vpop.f32.mrb[62].mxu1  ;;  %v2287_v62 = vpack.c.bf16 %v3215_v54, %v3211_v50  ;;  %v2738_v63 = vadd.f32 %v2737_v55, %v2187_v53 }
 0x220   : > { %v3217_v58 = vpop.eup %3216  ;;  %v2191_v61 = vpop.f32.mrb[62].mxu0  ;;  %v2741_v0 = vadd.f32 %v1805_v60, %v4042_v6 }
 0x221   : > { %v1807_v4 = vpop.f32.mrb[63].mxu1  ;;  %v2193_v5 = vpop.f32.mrb[63].mxu0  ;;  %v2288_v8 = vpack.c.bf16 %v3217_v58, %v3213_v51  ;;  %v2740_v9 = vadd.f32 %v2739_v59, %v2189_v57  ;;  %3226 = vtanh.f32 %v2738_v63 }
 0x222   : > { %v2743_v10 = vadd.f32 %v1807_v4, %v4044_v7  ;;  %v2742_v11 = vadd.f32 %v2741_v0, %v2191_v61 }
 0x223   : > { %2354 = vmatprep.subr.bf16.mxu1 %v2288_v8  ;;  %3228 = vtanh.f32 %v2740_v9  ;;  %v3219_v13 = vpop.eup %3218 }
 0x224   : > { %v2744_v12 = vadd.f32 %v2743_v10, %v2193_v5  ;;  %2355 = vmatpush1.bf16.xpose.msra.mxu1 %v2287_v62  ;;  %3230 = vtanh.f32 %v2742_v11 }
 0x225   : > { %v3221_v14 = vpop.eup %3220 }
 0x226   : > { %3232 = vtanh.f32 %v2744_v12  ;;  %v3223_v15 = vpop.eup %3222 }
 0x227   : > { %v2289_v6 = vpack.c.bf16 %v3223_v15, %v3219_v13  ;;  %v2297_v24 = vpop.permute.xlu0 %2296 }
 0x228   : > { %v3225_v16 = vpop.eup %3224  ;;  %v2302_v25 = vrot.slane %v2297_v24, %v776_v3 }
 0x229   : > { %v2290_v17 = vpack.c.bf16 %v3225_v16, %v3221_v14 }
 0x22b   : > { %2356 = vmatprep.subr.bf16.mxu1 %v2290_v17  ;;  %v3227_v18 = vpop.eup %3226 }
 0x22c   : > { %2357 = vmatpush1.bf16.xpose.msra.mxu1 %v2289_v6 }
 0x22d   : > { %v3229_v19 = vpop.eup %3228 }
 0x22e   : > { %v3231_v7 = vpop.eup %3230 }
 0x22f   : > { %v2291_v21 = vpack.c.bf16 %v3231_v7, %v3227_v18 }
 0x230   : > { %v3233_v20 = vpop.eup %3232 }
 0x231   : > { %v2292_v22 = vpack.c.bf16 %v3233_v20, %v3229_v19 }
 0x233   : > { %2358 = vmatprep.subr.bf16.mxu1 %v2292_v22 }
 0x234   : > { %2359 = vmatpush1.bf16.xpose.msra.mxu1 %v2291_v21 }
 0x23b   : > { %2361 = vmatmul.mubr.bf16.vlgmr.msra.gmra.mrb[64].mxu1 %v2318_v23 }
 0x30e   : > { %v2362_v26 = vpop.f32.mrb[64].mxu1 }
 0x30f   : > { %v2363_v27 = vadd.f32 %v2362_v26, %v2302_v25  ;;  %v2364_v28 = vpop.f32.mrb[65].mxu1 }
 0x310   : > { %v2365_v29 = vadd.f32 %v2364_v28, %v2302_v25  ;;  %v2366_v30 = vpop.f32.mrb[66].mxu1 }
 0x311   : > { %v2367_v31 = vpop.f32.mrb[67].mxu1 }
 0x312   : > { %v2371_v32 = vcombine.low %v2363_v27, %v2365_v29  ;;  %2399 = sbr.rel (!%p3372_p5) target bundleno = 820 (0x334), region = 44 }
 0x314   : > { %v2378_v33 = vrot.slane %v2371_v32, %v4062_v49 }
 0x316   : > { %v2385_v42 = vrot.slane %v2378_v33, %v4062_v49 }
 0x318   : > { %2391 = vst.msk [vmem:[%s237_s8] sm:$0x3] %vm2389_vm0, %v2385_v42 }
 0x319   : > { %s4196_s11 = smov (!%p2402_p11, %s2401_s11), 2 }
 0x31a   : > { %s4134_s12 = sshll.u32 %s4196_s11, 4 }
 0x31b   : > { %s2406_s14 = ssub.s32 32, %s4134_s12 }
 0x31c   : > { %2407 = vsyncadd %s4129_s9, %s2406_s14  ;;  %p2611_p12 = scmp.ne.s32.totalorder %s4134_s12, 0  ;;  %s4143_s29 = scalar_lea.hbm %s4188_s5, %s3473_s15 }
 0x31d   : > { %s2412_s18 = sshll.u32 %s237_s8, 4  ;;  %s3300_s19 = smov [#allocation3]   ;;  %s2413_s18 = int_to_ptr.vmem [resolvable:$true] %s2412_s18 }
 0x31e   : > { %s3234_s4 = scalar_lea.vmem %s2413_s18, %s4134_s12  ;;  %s3238_s24 = sshll.u32 %s3300_s19, 4  ;;  %s3239_s24 = int_to_ptr.vmem [resolvable:$false] %s3238_s24 }
 0x31f   : > { %p3235_p13 = scmp.ne.s32.totalorder %s2413_s18, %s3234_s4  ;;  %s3240_s26 = scalar_lea.vmem %s3239_s24, 64 }
 0x320   : > { %p3241_p2 = scmp.lt.s32.totalorder %s2413_s18, %s3239_s24  ;;  %p3242_p3 = scmp.lt.s32.totalorder %s3240_s26, %s3234_s4 }
 0x321   : > { %p3236_p0 = pnand %p3235_p13, %p2611_p12 }
 0x322   : > { %p3243_p4 = por %p3242_p3, %p3241_p2 }
 0x323   : > { %p3237_p1 = pneg %p3236_p0 }
 0x325   : > { %p3244_p5 = pnand %p3243_p4, %p3237_p1 }
 0x327   : > { %3247 = shalt.err (!%p3244_p5)
}
 0x328   : > { %s3248_s15 = scalar_lea.hbm %s4143_s29, %s4134_s12  ;;  %s3252_s6 = scalar_lea.hbm %s4188_s5, 48 }
 0x329   : > { %p3249_p7 = scmp.ne.s32.totalorder %s4143_s29, %s3248_s15  ;;  %p3253_p10 = scmp.lt.u32.totalorder %s4143_s29, %s4188_s5 }
 0x32a   : > { %p3254_p11 = scmp.lt.u32.totalorder %s3252_s6, %s3248_s15  ;;  %p3256_p0 = scmp.lt.u32.totalorder %s3248_s15, %s4143_s29 }
 0x32b   : > { %p3250_p8 = pnand %p3249_p7, %p2611_p12 }
 0x32c   : > { %p3255_p13 = por %p3254_p11, %p3253_p10 }
 0x32d   : > { %p3251_p9 = pneg %p3250_p8 }
 0x32e   : > { %p3257_p1 = por %p3256_p0, %p3255_p13 }
 0x330   : > { %p3258_p2 = pnand %p3257_p1, %p3251_p9 }
 0x332   : > { %3261 = shalt.err (!%p3258_p2)
}
 0x333   : > { %2415 = dma.vmem_to_hbm [thread:$0]  (%p2611_p12), %s2413_s18, %s4134_s12, %s4143_s29, %s4129_s9  }
 0x334 PF: > { %p2878_p3 = scmp.ge.s32.totalorder %s3296_s23, 2  ;;  %s2424_s10 = sand.u32 1, %s3284_s20  }
 0x335   : > { %s2425_s11 = scalar_lea.sflag [#allocation4], %s2424_s10 }
 0x336   : > { %p2875_p4 = pnand %p2878_p3, %p3376_p6 }
 0x338   : > { %3279 = dma.done.wait (!%p2875_p4), %s2425_s11, 32  }
 0x339   : > { %3281 = vsyncadd (!%p2875_p4), %s2425_s11, 4294967264  ;;  %p17_p5 = scmp.ge.s32.totalorder %s3359_s25, 4   ;;  %s4191_s20 = smov %s3288_s21 }
 0x33a   : > { %s4192_s21 = smov %s3292_s22  ;;  %s4193_s22 = smov %s3370_s28 }
 0x33b   : > { %s4194_s23 = smov %s3359_s25  ;;  %19 = sbr.rel (!%p17_p5) target bundleno = 6 (0x6), region = 75 }
 0x342   :  { %2430 = vsyncpa [#allocation4], 1 }
 0x343   :  { %2432 = vsyncpa [#allocation4 + $0x1], 1 }

</bundles_post_ra>
